<compile_context>
chip_gen: v7x
topology: tpu7x:2x2x1
jax: 0.10.0
libtpu: 0.0.40
codegen_flags: <defaults>
</compile_context>

<pallas_src>
import functools

import jax
import jax.numpy as jnp
from jax import lax
from jax.experimental import pallas as pl
from jax.experimental.pallas import tpu as pltpu

_LN_EPS = 1e-5        # PyTorch nn.LayerNorm default
_NEG_BIG = -1e30      # bias for padded head columns -> exp underflows to exactly 0

# row layout of the two packed parameter slabs (shared by pack_params and kernel)
_VEC_ROWS = ("emb_num_b", "emb_col_b", "attn_out_b", "ln1_g", "ln1_b",
             "ff_b2", "ln2_g", "ln2_b", "pff_b2", "pff_ln_g", "pff_ln_b")
_WIDE_ROWS = ("b_qkv", "ff_b1", "pff_b1", "b_lstm", "op_b")

_WEIGHT_ORDER = ("emb_num_w", "emb_col_w", "vec_slab", "wide_slab",
                 "w_qkv", "w_o", "ff_w1", "ff_w2", "pff_w1", "pff_w2",
                 "w_lstm", "op_w")


# ----------------------------- fused rollout kernel -----------------------------

def _actor_fused_kernel(
    # per-step inputs (blocked along the rollout grid axis)
    x_num_ref, x_col_ref,
    # initial recurrent state (read only at t == 0)
    h0_ref, c0_ref,
    # weights: grid-invariant VMEM blocks (DMA'd once per pallas_call)
    emb_num_w_ref, emb_col_w_ref,
    vec_slab_ref, wide_slab_ref,
    w_qkv_ref, w_o_ref,
    ff_w1_ref, ff_w2_ref,
    pff_w1_ref, pff_w2_ref,
    w_lstm_ref, op_w_ref,
    # outputs
    probs_ref, h_out_ref, c_out_ref,
    # scratch
    x_scr, ctx_scr, gin_scr, h_scr, c_scr,
    *, n_heads,
):
    f32 = jnp.float32
    n_num = x_num_ref.shape[1]
    n_col = x_col_ref.shape[1]
    S = n_num + n_col
    D = h0_ref.shape[1]
    d_head = D // n_heads
    d_ff_tab = ff_w1_ref.shape[1]
    d_ff = pff_w1_ref.shape[1]
    ops_pad = op_w_ref.shape[1]

    t = pl.program_id(0)

    # load the recurrent state into the VMEM carry at the first rollout step
    @pl.when(t == 0)
    def _():
        h_scr[...] = h0_ref[...]
        c_scr[...] = c0_ref[...]

    def mm(a, b):
        # activations are cast to the weight dtype (bf16 path), accumulate in f32
        return jnp.dot(a.astype(b.dtype), b, preferred_element_type=f32)

    def vrow(name):
        i = S + _VEC_ROWS.index(name)
        return vec_slab_ref[i:i + 1, :]

    def wrow(name, width):
        i = _WIDE_ROWS.index(name)
        return wide_slab_ref[i:i + 1, 0:width]

    def layernorm(x, g, b):
        mu = jnp.mean(x, axis=-1, keepdims=True)
        var = jnp.mean((x - mu) ** 2, axis=-1, keepdims=True)
        return (x - mu) * lax.rsqrt(var + _LN_EPS) * g + b

    def sigmoid(x):                     # divide-free: rides the otherwise-idle EUP
        return 0.5 * (jnp.tanh(0.5 * x) + 1.0)

    # --- folded embeddings: ONE matmul per branch (W1@W2 folded host-side) ---
    tok_num = mm(x_num_ref[0], emb_num_w_ref[...]) + vrow("emb_num_b")   # (n_num, D)
    tok_col = mm(x_col_ref[0], emb_col_w_ref[...]) + vrow("emb_col_b")   # (n_col, D)
    x_scr[0:n_num, :] = tok_num
    x_scr[n_num:S, :] = tok_col
    x = x_scr[...] + vec_slab_ref[0:S, :]                                # + pos emb

    # --- multi-head self-attention: ONE fused QKV matmul + ONE out-projection ---
    qkv = mm(x, w_qkv_ref[...]) + wrow("b_qkv", 3 * D)                   # (S, 3D)
    scale = 1.0 / float(d_head) ** 0.5
    for hh in range(n_heads):                                            # static unroll
        lo = hh * d_head
        qh = qkv[:, lo:lo + d_head]
        kh = qkv[:, D + lo:D + lo + d_head]
        vh = qkv[:, 2 * D + lo:2 * D + lo + d_head]
        s = jnp.einsum("qe,ke->qk", qh, kh, preferred_element_type=f32) * scale
        s = s - jnp.max(s, axis=-1, keepdims=True)
        e = jnp.exp(s)
        p = e * pl.reciprocal(jnp.sum(e, axis=-1, keepdims=True), approx=True)
        ctx_scr[:, lo:lo + d_head] = jnp.dot(p, vh, preferred_element_type=f32)
    attn = mm(ctx_scr[...], w_o_ref[...]) + vrow("attn_out_b") + x       # residual
    x = layernorm(attn, vrow("ln1_g"), vrow("ln1_b"))

    # --- encoder feed-forward + residual + LayerNorm ---
    hdn = jnp.maximum(mm(x, ff_w1_ref[...]) + wrow("ff_b1", d_ff_tab), 0.0)
    x = layernorm(mm(hdn, ff_w2_ref[...]) + vrow("ff_b2") + x,
                  vrow("ln2_g"), vrow("ln2_b"))

    # --- PoswiseFeedForwardNet (conv1x1 -> relu -> conv1x1 + residual + LN) ---
    hdn = jnp.maximum(mm(x, pff_w1_ref[...]) + wrow("pff_b1", d_ff), 0.0)
    enc = layernorm(mm(hdn, pff_w2_ref[...]) + vrow("pff_b2") + x,
                    vrow("pff_ln_g"), vrow("pff_ln_b"))

    # --- LSTMCell: ONE fused [enc, h] @ [Wih; Whh] matmul (gate order i,f,g,o) ---
    gin_scr[:, 0:D] = enc
    gin_scr[:, D:2 * D] = h_scr[...]
    gates = mm(gin_scr[...], w_lstm_ref[...]) + wrow("b_lstm", 4 * D)    # (S, 4D)
    i_g = sigmoid(gates[:, 0:D])
    f_g = sigmoid(gates[:, D:2 * D])
    g_g = jnp.tanh(gates[:, 2 * D:3 * D])
    o_g = sigmoid(gates[:, 3 * D:4 * D])
    c_new = f_g * c_scr[...] + i_g * g_g
    h_new = o_g * jnp.tanh(c_new)
    h_scr[...] = h_new
    c_scr[...] = c_new
    h_out_ref[...] = h_new
    c_out_ref[...] = c_new

    # --- Linear head -> nan->0 -> softmax (lane-dense, padded cols get prob 0) ---
    logits = mm(h_new, op_w_ref[...]) + wrow("op_b", ops_pad)
    logits = jnp.where(jnp.isnan(logits), jnp.zeros_like(logits), logits)
    m = jnp.max(logits, axis=-1, keepdims=True)
    e = jnp.exp(logits - m)
    # exact divide so the real (unpadded) columns sum to 1 exactly like torch.softmax
    probs_ref[0] = e / jnp.sum(e, axis=-1, keepdims=True)


# ----------------------------- parameters -----------------------------

def init_params(key, *, data_nums, n_num, n_cat, emb_dim, d_model,
                d_ff_tab, d_ff, operations):
    """Raw (PyTorch-equivalent, stored (in,out)) parameters for the reconstructed Actor."""
    ks = iter(jax.random.split(key, 64))

    def w(shape, scale=0.05):
        return scale * jax.random.normal(next(ks), shape, jnp.float32)

    z = lambda shape: jnp.zeros(shape, jnp.float32)
    one = lambda shape: jnp.ones(shape, jnp.float32)
    p = {}
    # TabTransformer-lite embeddings: per-feature stats (data_nums) -> emb_dim(8) -> dim(128)
    p["num_e1_w"], p["num_e1_b"] = w((data_nums, emb_dim)), z((1, emb_dim))
    p["num_e2_w"], p["num_e2_b"] = w((emb_dim, d_model)), z((1, d_model))
    p["col_e1_w"], p["col_e1_b"] = w((data_nums, emb_dim)), z((1, emb_dim))
    p["col_e2_w"], p["col_e2_b"] = w((emb_dim, d_model)), z((1, d_model))
    p["pos_emb"] = w((n_num + n_cat, d_model))
    # transformer encoder layer (depth=1, heads=4, dim=128)
    for nm in ("wq", "wk", "wv", "wo"):
        p[nm] = w((d_model, d_model))
    for nm in ("bq", "bk", "bv", "bo"):
        p[nm] = z((1, d_model))
    p["ln1_g"], p["ln1_b"] = one((1, d_model)), z((1, d_model))
    p["tab_ff_w1"], p["tab_ff_b1"] = w((d_model, d_ff_tab)), z((1, d_ff_tab))
    p["tab_ff_w2"], p["tab_ff_b2"] = w((d_ff_tab, d_model)), z((1, d_model))
    p["ln2_g"], p["ln2_b"] = one((1, d_model)), z((1, d_model))
    # PoswiseFeedForwardNet (Conv1d k=1 twice + residual + LayerNorm)
    p["pff_w1"], p["pff_b1"] = w((d_model, d_ff)), z((1, d_ff))
    p["pff_w2"], p["pff_b2"] = w((d_ff, d_model)), z((1, d_model))
    p["pff_ln_g"], p["pff_ln_b"] = one((1, d_model)), z((1, d_model))
    # SelectOperations: LSTMCell(d_model, d_model) + Linear(d_model, operations)
    # NOTE: wih/whh are stored transposed vs PyTorch (4H,in); b_lstm = b_ih + b_hh folded.
    p["wih"] = w((d_model, 4 * d_model))
    p["whh"] = w((d_model, 4 * d_model))
    p["b_lstm"] = z((1, 4 * d_model))
    p["op_w"], p["op_b"] = w((d_model, operations)), z((1, operations))
    return p


def pack_params(p, *, weight_dtype=jnp.bfloat16):
    """Host-side exact folding/packing into the operand set the fused kernel consumes."""
    f32 = jnp.float32
    S, D = p["pos_emb"].shape
    ops = p["op_w"].shape[1]
    ops_pad = ((ops + 127) // 128) * 128

    # (1) fold the two no-nonlinearity embedding linears: W1@W2, b1@W2 + b2 (exact)
    emb_num_w = p["num_e1_w"] @ p["num_e2_w"]
    emb_num_b = p["num_e1_b"] @ p["num_e2_w"] + p["num_e2_b"]
    emb_col_w = p["col_e1_w"] @ p["col_e2_w"]
    emb_col_b = p["col_e1_b"] @ p["col_e2_w"] + p["col_e2_b"]

    # (2) fuse Q/K/V projections and the two LSTM matmuls
    w_qkv = jnp.concatenate([p["wq"], p["wk"], p["wv"]], axis=1)      # (D, 3D)
    b_qkv = jnp.concatenate([p["bq"], p["bk"], p["bv"]], axis=1)      # (1, 3D)
    w_lstm = jnp.concatenate([p["wih"], p["whh"]], axis=0)            # (2D, 4D)

    # (3) pad the operation head to a lane-dense width; padded logits get -1e30 bias
    op_w_pad = jnp.zeros((D, ops_pad), f32).at[:, :ops].set(p["op_w"])
    op_b_pad = jnp.full((1, ops_pad), _NEG_BIG, f32).at[:, :ops].set(p["op_b"])

    # (4) ONE slab for pos_emb + all width-D vectors (biases / LayerNorm params)
    vec_rows = dict(
        emb_num_b=emb_num_b, emb_col_b=emb_col_b, attn_out_b=p["bo"],
        ln1_g=p["ln1_g"], ln1_b=p["ln1_b"], ff_b2=p["tab_ff_b2"],
        ln2_g=p["ln2_g"], ln2_b=p["ln2_b"], pff_b2=p["pff_b2"],
        pff_ln_g=p["pff_ln_g"], pff_ln_b=p["pff_ln_b"])
    vec_slab = jnp.concatenate(
        [p["pos_emb"].astype(f32)] + [vec_rows[n].astype(f32) for n in _VEC_ROWS],
        axis=0)                                                       # (S+11, D)

    # (5) ONE slab for the wide biases (zero-padded to a common lane width)
    wide_rows = dict(b_qkv=b_qkv, ff_b1=p["tab_ff_b1"], pff_b1=p["pff_b1"],
                     b_lstm=p["b_lstm"], op_b=op_b_pad)
    wide_w = max(v.shape[1] for v in wide_rows.values())

    def _padw(v):
        return jnp.zeros((1, wide_w), f32).at[:, :v.shape[1]].set(v.astype(f32))

    wide_slab = jnp.concatenate([_padw(wide_rows[n]) for n in _WIDE_ROWS], axis=0)

    wd = weight_dtype   # bf16 on v6e/v7x; elementwise math stays f32 (v5e-safe)
    return dict(
        emb_num_w=emb_num_w.astype(wd), emb_col_w=emb_col_w.astype(wd),
        vec_slab=vec_slab, wide_slab=wide_slab,
        w_qkv=w_qkv.astype(wd), w_o=p["wo"].astype(wd),
        ff_w1=p["tab_ff_w1"].astype(wd), ff_w2=p["tab_ff_w2"].astype(wd),
        pff_w1=p["pff_w1"].astype(wd), pff_w2=p["pff_w2"].astype(wd),
        w_lstm=w_lstm.astype(wd), op_w=op_w_pad.astype(wd),
    )


# ----------------------------- wrappers -----------------------------

def actor_rollout(packed, input_num_seq, input_col_seq, h0, c0, *,
                  n_heads, operations):
    """Run T Actor.forward steps in ONE pallas_call: grid=(T,), resident weights,
    h/c carried across steps in VMEM scratch."""
    f32 = jnp.float32
    T, n_num, data_nums = input_num_seq.shape
    n_col = input_col_seq.shape[1]
    S, D = h0.shape
    ops_pad = packed["op_w"].shape[1]
    weights = [packed[k] for k in _WEIGHT_ORDER]

    def const_spec(arr):   # grid-invariant block: DMA'd once, stays in VMEM
        return pl.BlockSpec(arr.shape, lambda t, _nd=arr.ndim: (0,) * _nd)

    in_specs = [
        pl.BlockSpec((1, n_num, data_nums), lambda t: (t, 0, 0)),
        pl.BlockSpec((1, n_col, data_nums), lambda t: (t, 0, 0)),
        const_spec(h0), const_spec(c0),
    ] + [const_spec(w) for w in weights]

    out_shapes = (
        jax.ShapeDtypeStruct((T, S, ops_pad), f32),   # per-step padded softmax
        jax.ShapeDtypeStruct((S, D), f32),            # h after last step
        jax.ShapeDtypeStruct((S, D), f32),            # c after last step
    )
    out_specs = [
        pl.BlockSpec((1, S, ops_pad), lambda t: (t, 0, 0)),
        pl.BlockSpec((S, D), lambda t: (0, 0)),
        pl.BlockSpec((S, D), lambda t: (0, 0)),
    ]

    probs_pad, h_t, c_t = pl.pallas_call(
        functools.partial(_actor_fused_kernel, n_heads=n_heads),
        out_shape=out_shapes,
        grid_spec=pltpu.PrefetchScalarGridSpec(
            num_scalar_prefetch=0,
            grid=(T,),
            in_specs=in_specs,
            out_specs=out_specs,
            scratch_shapes=[
                pltpu.VMEM((S, D), f32),        # token stack + pos
                pltpu.VMEM((S, D), f32),        # per-head ctx (lane-offset writes)
                pltpu.VMEM((S, 2 * D), f32),    # [enc, h] for the fused LSTM matmul
                pltpu.VMEM((S, D), f32),        # h carry across rollout steps
                pltpu.VMEM((S, D), f32),        # c carry across rollout steps
            ]),
        compiler_params=pltpu.CompilerParams(
            dimension_semantics=("arbitrary",)),      # sequential: carried h/c
    )(input_num_seq, input_col_seq, h0, c0, *weights)

    # padded head columns carry exactly-zero probability; slice them off on host
    return probs_pad[:, :, :operations], h_t, c_t


def actor_forward(packed, input_num, input_col, h, c, step, *, n_heads, operations):
    """Single-step Actor.forward (original module semantics) == rollout with T=1."""
    del step  # step is not used by the PyTorch forward math either
    probs_seq, h1, c1 = actor_rollout(packed, input_num[None], input_col[None],
                                      h, c, n_heads=n_heads, operations=operations)
    return probs_seq[0], h1, c1


# ----------------------------- demo -----------------------------

if __name__ == "__main__":
    DATA_NUMS = 16       # n_samples statistic length per feature
    N_NUM, N_CAT = 4, 4  # numeric / categorical feature tokens
    EMB_DIM = 8
    D_MODEL = 128        # TabTransformer dim -> d_model of pos_ffn
    D_FF_TAB = 256       # transformer FF width
    D_FF = 256           # PoswiseFeedForwardNet d_ff
    N_HEADS = 4
    OPERATIONS = 16
    S = N_NUM + N_CAT
    T = 4                # rollout length for the grid-over-timesteps path

    key = jax.random.PRNGKey(0)
    k_params, k_num, k_col = jax.random.split(key, 3)
    raw = init_params(k_params, data_nums=DATA_NUMS, n_num=N_NUM, n_cat=N_CAT,
                      emb_dim=EMB_DIM, d_model=D_MODEL, d_ff_tab=D_FF_TAB,
                      d_ff=D_FF, operations=OPERATIONS)
    packed = pack_params(raw, weight_dtype=jnp.bfloat16)   # bf16 MXU, f32 accumulation

    input_num_seq = jax.random.normal(k_num, (T, N_NUM, DATA_NUMS), jnp.float32)
    input_col_seq = jax.random.normal(k_col, (T, N_CAT, DATA_NUMS), jnp.float32)
    h0 = jnp.zeros((S, D_MODEL), jnp.float32)
    c0 = jnp.zeros((S, D_MODEL), jnp.float32)

    # single-step forward (original Actor.forward semantics)
    fwd = jax.jit(functools.partial(actor_forward, n_heads=N_HEADS,
                                    operations=OPERATIONS))
    probs1, h1, c1 = fwd(packed, input_num_seq[0], input_col_seq[0], h0, c0, 0)
    jax.block_until_ready((probs1, h1, c1))

    # multi-step rollout: one kernel launch, weights DMA'd once, h/c in VMEM carry
    rollout = jax.jit(functools.partial(actor_rollout, n_heads=N_HEADS,
                                        operations=OPERATIONS))
    probs_seq, hT, cT = rollout(packed, input_num_seq, input_col_seq, h0, c0)
    jax.block_until_ready((probs_seq, hT, cT))

    assert probs1.shape == (S, OPERATIONS)
    assert h1.shape == (S, D_MODEL) and c1.shape == (S, D_MODEL)
    assert probs_seq.shape == (T, S, OPERATIONS)
    assert hT.shape == (S, D_MODEL) and cT.shape == (S, D_MODEL)
    assert bool(jnp.all(jnp.isfinite(probs1)))
    assert bool(jnp.all(jnp.isfinite(probs_seq)))
    assert bool(jnp.all(jnp.abs(jnp.sum(probs1, axis=-1) - 1.0) < 1e-4))
    assert bool(jnp.all(jnp.abs(jnp.sum(probs_seq, axis=-1) - 1.0) < 1e-4))
    # step 0 of the rollout must reproduce the single-step forward
    assert bool(jnp.allclose(probs_seq[0], probs1, atol=1e-5, rtol=1e-4))
    print("KERNEL_OK")
</pallas_src>

<mosaic_0001>
module attributes {stable_mosaic.version = 11 : i64} {
  func.func @_actor_fused_kernel(%arg0: i32, %arg1: memref<1x4x16xf32, #tpu.memory_space<vmem>>, %arg2: memref<1x4x16xf32, #tpu.memory_space<vmem>>, %arg3: memref<8x128xf32, #tpu.memory_space<vmem>>, %arg4: memref<8x128xf32, #tpu.memory_space<vmem>>, %arg5: memref<16x128xbf16, #tpu.memory_space<vmem>>, %arg6: memref<16x128xbf16, #tpu.memory_space<vmem>>, %arg7: memref<19x128xf32, #tpu.memory_space<vmem>>, %arg8: memref<5x512xf32, #tpu.memory_space<vmem>>, %arg9: memref<128x384xbf16, #tpu.memory_space<vmem>>, %arg10: memref<128x128xbf16, #tpu.memory_space<vmem>>, %arg11: memref<128x256xbf16, #tpu.memory_space<vmem>>, %arg12: memref<256x128xbf16, #tpu.memory_space<vmem>>, %arg13: memref<128x256xbf16, #tpu.memory_space<vmem>>, %arg14: memref<256x128xbf16, #tpu.memory_space<vmem>>, %arg15: memref<256x512xbf16, #tpu.memory_space<vmem>>, %arg16: memref<128x128xbf16, #tpu.memory_space<vmem>>, %arg17: memref<1x8x128xf32, #tpu.memory_space<vmem>>, %arg18: memref<8x128xf32, #tpu.memory_space<vmem>>, %arg19: memref<8x128xf32, #tpu.memory_space<vmem>>, %arg20: memref<8x128xf32, #tpu.memory_space<vmem>>, %arg21: memref<8x128xf32, #tpu.memory_space<vmem>>, %arg22: memref<8x256xf32, #tpu.memory_space<vmem>>, %arg23: memref<8x128xf32, #tpu.memory_space<vmem>>, %arg24: memref<8x128xf32, #tpu.memory_space<vmem>>) attributes {dimension_semantics = [#tpu.dimension_semantics<arbitrary>], iteration_bounds = array<i64: 1>, scalar_prefetch = 0 : i64, scratch_operands = 5 : i64, tpu.core_type = #tpu.core_type<tc>, window_params = [{transform_indices = @transform_0, window_bounds = array<i64: 1, 4, 16>}, {transform_indices = @transform_1, window_bounds = array<i64: 1, 4, 16>}, {pipeline_mode = #tpu.pipeline_mode<synchronous>, transform_indices = @transform_2, window_bounds = array<i64: 8, 128>}, {pipeline_mode = #tpu.pipeline_mode<synchronous>, transform_indices = @transform_3, window_bounds = array<i64: 8, 128>}, {pipeline_mode = #tpu.pipeline_mode<synchronous>, transform_indices = @transform_4, window_bounds = array<i64: 16, 128>}, {pipeline_mode = #tpu.pipeline_mode<synchronous>, transform_indices = @transform_5, window_bounds = array<i64: 16, 128>}, {pipeline_mode = #tpu.pipeline_mode<synchronous>, transform_indices = @transform_6, window_bounds = array<i64: 19, 128>}, {pipeline_mode = #tpu.pipeline_mode<synchronous>, transform_indices = @transform_7, window_bounds = array<i64: 5, 512>}, {pipeline_mode = #tpu.pipeline_mode<synchronous>, transform_indices = @transform_8, window_bounds = array<i64: 128, 384>}, {pipeline_mode = #tpu.pipeline_mode<synchronous>, transform_indices = @transform_9, window_bounds = array<i64: 128, 128>}, {pipeline_mode = #tpu.pipeline_mode<synchronous>, transform_indices = @transform_10, window_bounds = array<i64: 128, 256>}, {pipeline_mode = #tpu.pipeline_mode<synchronous>, transform_indices = @transform_11, window_bounds = array<i64: 256, 128>}, {pipeline_mode = #tpu.pipeline_mode<synchronous>, transform_indices = @transform_12, window_bounds = array<i64: 128, 256>}, {pipeline_mode = #tpu.pipeline_mode<synchronous>, transform_indices = @transform_13, window_bounds = array<i64: 256, 128>}, {pipeline_mode = #tpu.pipeline_mode<synchronous>, transform_indices = @transform_14, window_bounds = array<i64: 256, 512>}, {pipeline_mode = #tpu.pipeline_mode<synchronous>, transform_indices = @transform_15, window_bounds = array<i64: 128, 128>}, {transform_indices = @transform_16, window_bounds = array<i64: 1, 8, 128>}, {pipeline_mode = #tpu.pipeline_mode<synchronous>, transform_indices = @transform_17, window_bounds = array<i64: 8, 128>}, {pipeline_mode = #tpu.pipeline_mode<synchronous>, transform_indices = @transform_18, window_bounds = array<i64: 8, 128>}]} {
    %c0_i32 = arith.constant 0 : i32
    %0 = arith.cmpi eq, %arg0, %c0_i32 : i32
    %1 = arith.extui %0 : i1 to i32
    %c0_i32_0 = arith.constant 0 : i32
    %2 = arith.cmpi ne, %1, %c0_i32_0 : i32
    scf.if %2 {
      %c0_136 = arith.constant 0 : index
      %c0_137 = arith.constant 0 : index
      %279 = vector.load %arg3[%c0_136, %c0_137] : memref<8x128xf32, #tpu.memory_space<vmem>>, vector<8x128xf32>
      %c0_138 = arith.constant 0 : index
      %c0_139 = arith.constant 0 : index
      %280 = vector.load %arg23[%c0_138, %c0_139] : memref<8x128xf32, #tpu.memory_space<vmem>>, vector<8x128xf32>
      tpu.vector_store %arg23[%c0_138, %c0_139], %279 {strides = array<i32>} : memref<8x128xf32, #tpu.memory_space<vmem>>, vector<8x128xf32>,
      %c0_140 = arith.constant 0 : index
      %c0_141 = arith.constant 0 : index
      %281 = vector.load %arg4[%c0_140, %c0_141] : memref<8x128xf32, #tpu.memory_space<vmem>>, vector<8x128xf32>
      %c0_142 = arith.constant 0 : index
      %c0_143 = arith.constant 0 : index
      %282 = vector.load %arg24[%c0_142, %c0_143] : memref<8x128xf32, #tpu.memory_space<vmem>>, vector<8x128xf32>
      tpu.vector_store %arg24[%c0_142, %c0_143], %281 {strides = array<i32>} : memref<8x128xf32, #tpu.memory_space<vmem>>, vector<8x128xf32>,
    } else {
    }
    %c0 = arith.constant 0 : index
    %c0_1 = arith.constant 0 : index
    %c0_2 = arith.constant 0 : index
    %3 = vector.load %arg1[%c0, %c0_1, %c0_2] : memref<1x4x16xf32, #tpu.memory_space<vmem>>, vector<1x4x16xf32>
    %4 = vector.shape_cast %3 : vector<1x4x16xf32> to vector<4x16xf32>
    %c0_3 = arith.constant 0 : index
    %c0_4 = arith.constant 0 : index
    %5 = vector.load %arg5[%c0_3, %c0_4] : memref<16x128xbf16, #tpu.memory_space<vmem>>, vector<16x128xbf16>
    %6 = arith.truncf %4 : vector<4x16xf32> to vector<4x16xbf16>
    %cst = arith.constant dense<0.000000e+00> : vector<4x128xf32>
    %7 = tpu.matmul %6, %5, %cst {dimension_numbers = #tpu.dot_dimension_numbers<[1], [0], [0], [1], [0, 0, 1, 1], [], []>} : vector<4x16xbf16>, vector<16x128xbf16>, vector<4x128xf32> -> vector<4x128xf32>
    %c8 = arith.constant 8 : index
    %c0_5 = arith.constant 0 : index
    %8 = vector.load %arg7[%c8, %c0_5] : memref<19x128xf32, #tpu.memory_space<vmem>>, vector<1x128xf32>
    %9 = vector.broadcast %8 : vector<1x128xf32> to vector<4x128xf32>
    %10 = arith.addf %7, %9 : vector<4x128xf32>
    %c0_6 = arith.constant 0 : index
    %c0_7 = arith.constant 0 : index
    %c0_8 = arith.constant 0 : index
    %11 = vector.load %arg2[%c0_6, %c0_7, %c0_8] : memref<1x4x16xf32, #tpu.memory_space<vmem>>, vector<1x4x16xf32>
    %12 = vector.shape_cast %11 : vector<1x4x16xf32> to vector<4x16xf32>
    %c0_9 = arith.constant 0 : index
    %c0_10 = arith.constant 0 : index
    %13 = vector.load %arg6[%c0_9, %c0_10] : memref<16x128xbf16, #tpu.memory_space<vmem>>, vector<16x128xbf16>
    %14 = arith.truncf %12 : vector<4x16xf32> to vector<4x16xbf16>
    %cst_11 = arith.constant dense<0.000000e+00> : vector<4x128xf32>
    %15 = tpu.matmul %14, %13, %cst_11 {dimension_numbers = #tpu.dot_dimension_numbers<[1], [0], [0], [1], [0, 0, 1, 1], [], []>} : vector<4x16xbf16>, vector<16x128xbf16>, vector<4x128xf32> -> vector<4x128xf32>
    %c9 = arith.constant 9 : index
    %c0_12 = arith.constant 0 : index
    %16 = vector.load %arg7[%c9, %c0_12] : memref<19x128xf32, #tpu.memory_space<vmem>>, vector<1x128xf32>
    %17 = vector.broadcast %16 : vector<1x128xf32> to vector<4x128xf32>
    %18 = arith.addf %15, %17 : vector<4x128xf32>
    %c0_13 = arith.constant 0 : index
    %c0_14 = arith.constant 0 : index
    %19 = vector.load %arg20[%c0_13, %c0_14] : memref<8x128xf32, #tpu.memory_space<vmem>>, vector<4x128xf32>
    tpu.vector_store %arg20[%c0_13, %c0_14], %10 {strides = array<i32>} : memref<8x128xf32, #tpu.memory_space<vmem>>, vector<4x128xf32>,
    %c4 = arith.constant 4 : index
    %c0_15 = arith.constant 0 : index
    %20 = vector.load %arg20[%c4, %c0_15] : memref<8x128xf32, #tpu.memory_space<vmem>>, vector<4x128xf32>
    tpu.vector_store %arg20[%c4, %c0_15], %18 {strides = array<i32>} : memref<8x128xf32, #tpu.memory_space<vmem>>, vector<4x128xf32>,
    %c0_16 = arith.constant 0 : index
    %c0_17 = arith.constant 0 : index
    %21 = vector.load %arg20[%c0_16, %c0_17] : memref<8x128xf32, #tpu.memory_space<vmem>>, vector<8x128xf32>
    %c0_18 = arith.constant 0 : index
    %c0_19 = arith.constant 0 : index
    %22 = vector.load %arg7[%c0_18, %c0_19] : memref<19x128xf32, #tpu.memory_space<vmem>>, vector<8x128xf32>
    %23 = arith.addf %21, %22 : vector<8x128xf32>
    %c0_20 = arith.constant 0 : index
    %c0_21 = arith.constant 0 : index
    %24 = vector.load %arg9[%c0_20, %c0_21] : memref<128x384xbf16, #tpu.memory_space<vmem>>, vector<128x384xbf16>
    %25 = arith.truncf %23 : vector<8x128xf32> to vector<8x128xbf16>
    %cst_22 = arith.constant dense<0.000000e+00> : vector<8x384xf32>
    %26 = tpu.matmul %25, %24, %cst_22 {dimension_numbers = #tpu.dot_dimension_numbers<[1], [0], [0], [1], [0, 0, 1, 1], [], []>} : vector<8x128xbf16>, vector<128x384xbf16>, vector<8x384xf32> -> vector<8x384xf32>
    %c0_23 = arith.constant 0 : index
    %c0_24 = arith.constant 0 : index
    %27 = vector.load %arg8[%c0_23, %c0_24] : memref<5x512xf32, #tpu.memory_space<vmem>>, vector<1x384xf32>
    %28 = vector.broadcast %27 : vector<1x384xf32> to vector<8x384xf32>
    %29 = arith.addf %26, %28 : vector<8x384xf32>
    %30 = vector.extract_strided_slice %29 {offsets = [0, 0], sizes = [8, 32], strides = [1, 1]} : vector<8x384xf32> to vector<8x32xf32>
    %31 = vector.extract_strided_slice %29 {offsets = [0, 128], sizes = [8, 32], strides = [1, 1]} : vector<8x384xf32> to vector<8x32xf32>
    %32 = vector.extract_strided_slice %29 {offsets = [0, 256], sizes = [8, 32], strides = [1, 1]} : vector<8x384xf32> to vector<8x32xf32>
    "tpu.trace_start"() <{level = 10 : i32, message = "qe,ke->qk"}> : () -> ()
    %cst_25 = arith.constant dense<0.000000e+00> : vector<8x8xf32>
    %33 = tpu.matmul %30, %31, %cst_25 {dimension_numbers = #tpu.dot_dimension_numbers<[1], [1], [0], [0], [0, 0, 1, 0], [], []>} : vector<8x32xf32>, vector<8x32xf32>, vector<8x8xf32> -> vector<8x8xf32>
    "tpu.trace_stop"() : () -> ()
    %cst_26 = arith.constant 0.176776692 : f32
    %34 = vector.broadcast %cst_26 : f32 to vector<8x8xf32>
    %35 = arith.mulf %33, %34 : vector<8x8xf32>
    %cst_27 = arith.constant dense<0xFF800000> : vector<8xf32>
    %36 = vector.multi_reduction <maximumf>, %35, %cst_27 [1] : vector<8x8xf32> to vector<8xf32>
    %37 = vector.shape_cast %36 : vector<8xf32> to vector<8x1xf32>
    %38 = vector.broadcast %37 : vector<8x1xf32> to vector<8x8xf32>
    %39 = arith.subf %35, %38 : vector<8x8xf32>
    %40 = math.exp %39 : vector<8x8xf32>
    %cst_28 = arith.constant dense<0.000000e+00> : vector<8xf32>
    %41 = vector.multi_reduction <add>, %40, %cst_28 [1] : vector<8x8xf32> to vector<8xf32>
    %42 = vector.shape_cast %41 : vector<8xf32> to vector<8x1xf32>
    %43 = tpu.reciprocal %42 {approx = true} : vector<8x1xf32> -> vector<8x1xf32>
    %44 = vector.broadcast %43 : vector<8x1xf32> to vector<8x8xf32>
    %45 = arith.mulf %40, %44 : vector<8x8xf32>
    %cst_29 = arith.constant dense<0.000000e+00> : vector<8x32xf32>
    %46 = tpu.matmul %45, %32, %cst_29 {dimension_numbers = #tpu.dot_dimension_numbers<[1], [0], [0], [1], [0, 0, 1, 1], [], []>} : vector<8x8xf32>, vector<8x32xf32>, vector<8x32xf32> -> vector<8x32xf32>
    %c0_30 = arith.constant 0 : index
    %c0_31 = arith.constant 0 : index
    %47 = vector.load %arg21[%c0_30, %c0_31] : memref<8x128xf32, #tpu.memory_space<vmem>>, vector<8x32xf32>
    tpu.vector_store %arg21[%c0_30, %c0_31], %46 {strides = array<i32>} : memref<8x128xf32, #tpu.memory_space<vmem>>, vector<8x32xf32>,
    %48 = vector.extract_strided_slice %29 {offsets = [0, 32], sizes = [8, 32], strides = [1, 1]} : vector<8x384xf32> to vector<8x32xf32>
    %49 = vector.extract_strided_slice %29 {offsets = [0, 160], sizes = [8, 32], strides = [1, 1]} : vector<8x384xf32> to vector<8x32xf32>
    %50 = vector.extract_strided_slice %29 {offsets = [0, 288], sizes = [8, 32], strides = [1, 1]} : vector<8x384xf32> to vector<8x32xf32>
    "tpu.trace_start"() <{level = 10 : i32, message = "qe,ke->qk"}> : () -> ()
    %cst_32 = arith.constant dense<0.000000e+00> : vector<8x8xf32>
    %51 = tpu.matmul %48, %49, %cst_32 {dimension_numbers = #tpu.dot_dimension_numbers<[1], [1], [0], [0], [0, 0, 1, 0], [], []>} : vector<8x32xf32>, vector<8x32xf32>, vector<8x8xf32> -> vector<8x8xf32>
    "tpu.trace_stop"() : () -> ()
    %cst_33 = arith.constant 0.176776692 : f32
    %52 = vector.broadcast %cst_33 : f32 to vector<8x8xf32>
    %53 = arith.mulf %51, %52 : vector<8x8xf32>
    %cst_34 = arith.constant dense<0xFF800000> : vector<8xf32>
    %54 = vector.multi_reduction <maximumf>, %53, %cst_34 [1] : vector<8x8xf32> to vector<8xf32>
    %55 = vector.shape_cast %54 : vector<8xf32> to vector<8x1xf32>
    %56 = vector.broadcast %55 : vector<8x1xf32> to vector<8x8xf32>
    %57 = arith.subf %53, %56 : vector<8x8xf32>
    %58 = math.exp %57 : vector<8x8xf32>
    %cst_35 = arith.constant dense<0.000000e+00> : vector<8xf32>
    %59 = vector.multi_reduction <add>, %58, %cst_35 [1] : vector<8x8xf32> to vector<8xf32>
    %60 = vector.shape_cast %59 : vector<8xf32> to vector<8x1xf32>
    %61 = tpu.reciprocal %60 {approx = true} : vector<8x1xf32> -> vector<8x1xf32>
    %62 = vector.broadcast %61 : vector<8x1xf32> to vector<8x8xf32>
    %63 = arith.mulf %58, %62 : vector<8x8xf32>
    %cst_36 = arith.constant dense<0.000000e+00> : vector<8x32xf32>
    %64 = tpu.matmul %63, %50, %cst_36 {dimension_numbers = #tpu.dot_dimension_numbers<[1], [0], [0], [1], [0, 0, 1, 1], [], []>} : vector<8x8xf32>, vector<8x32xf32>, vector<8x32xf32> -> vector<8x32xf32>
    %c0_37 = arith.constant 0 : index
    %c32 = arith.constant 32 : index
    %65 = vector.load %arg21[%c0_37, %c32] : memref<8x128xf32, #tpu.memory_space<vmem>>, vector<8x32xf32>
    tpu.vector_store %arg21[%c0_37, %c32], %64 {strides = array<i32>} : memref<8x128xf32, #tpu.memory_space<vmem>>, vector<8x32xf32>,
    %66 = vector.extract_strided_slice %29 {offsets = [0, 64], sizes = [8, 32], strides = [1, 1]} : vector<8x384xf32> to vector<8x32xf32>
    %67 = vector.extract_strided_slice %29 {offsets = [0, 192], sizes = [8, 32], strides = [1, 1]} : vector<8x384xf32> to vector<8x32xf32>
    %68 = vector.extract_strided_slice %29 {offsets = [0, 320], sizes = [8, 32], strides = [1, 1]} : vector<8x384xf32> to vector<8x32xf32>
    "tpu.trace_start"() <{level = 10 : i32, message = "qe,ke->qk"}> : () -> ()
    %cst_38 = arith.constant dense<0.000000e+00> : vector<8x8xf32>
    %69 = tpu.matmul %66, %67, %cst_38 {dimension_numbers = #tpu.dot_dimension_numbers<[1], [1], [0], [0], [0, 0, 1, 0], [], []>} : vector<8x32xf32>, vector<8x32xf32>, vector<8x8xf32> -> vector<8x8xf32>
    "tpu.trace_stop"() : () -> ()
    %cst_39 = arith.constant 0.176776692 : f32
    %70 = vector.broadcast %cst_39 : f32 to vector<8x8xf32>
    %71 = arith.mulf %69, %70 : vector<8x8xf32>
    %cst_40 = arith.constant dense<0xFF800000> : vector<8xf32>
    %72 = vector.multi_reduction <maximumf>, %71, %cst_40 [1] : vector<8x8xf32> to vector<8xf32>
    %73 = vector.shape_cast %72 : vector<8xf32> to vector<8x1xf32>
    %74 = vector.broadcast %73 : vector<8x1xf32> to vector<8x8xf32>
    %75 = arith.subf %71, %74 : vector<8x8xf32>
    %76 = math.exp %75 : vector<8x8xf32>
    %cst_41 = arith.constant dense<0.000000e+00> : vector<8xf32>
    %77 = vector.multi_reduction <add>, %76, %cst_41 [1] : vector<8x8xf32> to vector<8xf32>
    %78 = vector.shape_cast %77 : vector<8xf32> to vector<8x1xf32>
    %79 = tpu.reciprocal %78 {approx = true} : vector<8x1xf32> -> vector<8x1xf32>
    %80 = vector.broadcast %79 : vector<8x1xf32> to vector<8x8xf32>
    %81 = arith.mulf %76, %80 : vector<8x8xf32>
    %cst_42 = arith.constant dense<0.000000e+00> : vector<8x32xf32>
    %82 = tpu.matmul %81, %68, %cst_42 {dimension_numbers = #tpu.dot_dimension_numbers<[1], [0], [0], [1], [0, 0, 1, 1], [], []>} : vector<8x8xf32>, vector<8x32xf32>, vector<8x32xf32> -> vector<8x32xf32>
    %c0_43 = arith.constant 0 : index
    %c64 = arith.constant 64 : index
    %83 = vector.load %arg21[%c0_43, %c64] : memref<8x128xf32, #tpu.memory_space<vmem>>, vector<8x32xf32>
    tpu.vector_store %arg21[%c0_43, %c64], %82 {strides = array<i32>} : memref<8x128xf32, #tpu.memory_space<vmem>>, vector<8x32xf32>,
    %84 = vector.extract_strided_slice %29 {offsets = [0, 96], sizes = [8, 32], strides = [1, 1]} : vector<8x384xf32> to vector<8x32xf32>
    %85 = vector.extract_strided_slice %29 {offsets = [0, 224], sizes = [8, 32], strides = [1, 1]} : vector<8x384xf32> to vector<8x32xf32>
    %86 = vector.extract_strided_slice %29 {offsets = [0, 352], sizes = [8, 32], strides = [1, 1]} : vector<8x384xf32> to vector<8x32xf32>
    "tpu.trace_start"() <{level = 10 : i32, message = "qe,ke->qk"}> : () -> ()
    %cst_44 = arith.constant dense<0.000000e+00> : vector<8x8xf32>
    %87 = tpu.matmul %84, %85, %cst_44 {dimension_numbers = #tpu.dot_dimension_numbers<[1], [1], [0], [0], [0, 0, 1, 0], [], []>} : vector<8x32xf32>, vector<8x32xf32>, vector<8x8xf32> -> vector<8x8xf32>
    "tpu.trace_stop"() : () -> ()
    %cst_45 = arith.constant 0.176776692 : f32
    %88 = vector.broadcast %cst_45 : f32 to vector<8x8xf32>
    %89 = arith.mulf %87, %88 : vector<8x8xf32>
    %cst_46 = arith.constant dense<0xFF800000> : vector<8xf32>
    %90 = vector.multi_reduction <maximumf>, %89, %cst_46 [1] : vector<8x8xf32> to vector<8xf32>
    %91 = vector.shape_cast %90 : vector<8xf32> to vector<8x1xf32>
    %92 = vector.broadcast %91 : vector<8x1xf32> to vector<8x8xf32>
    %93 = arith.subf %89, %92 : vector<8x8xf32>
    %94 = math.exp %93 : vector<8x8xf32>
    %cst_47 = arith.constant dense<0.000000e+00> : vector<8xf32>
    %95 = vector.multi_reduction <add>, %94, %cst_47 [1] : vector<8x8xf32> to vector<8xf32>
    %96 = vector.shape_cast %95 : vector<8xf32> to vector<8x1xf32>
    %97 = tpu.reciprocal %96 {approx = true} : vector<8x1xf32> -> vector<8x1xf32>
    %98 = vector.broadcast %97 : vector<8x1xf32> to vector<8x8xf32>
    %99 = arith.mulf %94, %98 : vector<8x8xf32>
    %cst_48 = arith.constant dense<0.000000e+00> : vector<8x32xf32>
    %100 = tpu.matmul %99, %86, %cst_48 {dimension_numbers = #tpu.dot_dimension_numbers<[1], [0], [0], [1], [0, 0, 1, 1], [], []>} : vector<8x8xf32>, vector<8x32xf32>, vector<8x32xf32> -> vector<8x32xf32>
    %c0_49 = arith.constant 0 : index
    %c96 = arith.constant 96 : index
    %101 = vector.load %arg21[%c0_49, %c96] : memref<8x128xf32, #tpu.memory_space<vmem>>, vector<8x32xf32>
    tpu.vector_store %arg21[%c0_49, %c96], %100 {strides = array<i32>} : memref<8x128xf32, #tpu.memory_space<vmem>>, vector<8x32xf32>,
    %c0_50 = arith.constant 0 : index
    %c0_51 = arith.constant 0 : index
    %102 = vector.load %arg21[%c0_50, %c0_51] : memref<8x128xf32, #tpu.memory_space<vmem>>, vector<8x128xf32>
    %c0_52 = arith.constant 0 : index
    %c0_53 = arith.constant 0 : index
    %103 = vector.load %arg10[%c0_52, %c0_53] : memref<128x128xbf16, #tpu.memory_space<vmem>>, vector<128x128xbf16>
    %104 = arith.truncf %102 : vector<8x128xf32> to vector<8x128xbf16>
    %cst_54 = arith.constant dense<0.000000e+00> : vector<8x128xf32>
    %105 = tpu.matmul %104, %103, %cst_54 {dimension_numbers = #tpu.dot_dimension_numbers<[1], [0], [0], [1], [0, 0, 1, 1], [], []>} : vector<8x128xbf16>, vector<128x128xbf16>, vector<8x128xf32> -> vector<8x128xf32>
    %c10 = arith.constant 10 : index
    %c0_55 = arith.constant 0 : index
    %106 = vector.load %arg7[%c10, %c0_55] : memref<19x128xf32, #tpu.memory_space<vmem>>, vector<1x128xf32>
    %107 = vector.broadcast %106 : vector<1x128xf32> to vector<8x128xf32>
    %108 = arith.addf %105, %107 : vector<8x128xf32>
    %109 = arith.addf %108, %23 : vector<8x128xf32>
    %c11 = arith.constant 11 : index
    %c0_56 = arith.constant 0 : index
    %110 = vector.load %arg7[%c11, %c0_56] : memref<19x128xf32, #tpu.memory_space<vmem>>, vector<1x128xf32>
    %c12 = arith.constant 12 : index
    %c0_57 = arith.constant 0 : index
    %111 = vector.load %arg7[%c12, %c0_57] : memref<19x128xf32, #tpu.memory_space<vmem>>, vector<1x128xf32>
    %cst_58 = arith.constant dense<0.000000e+00> : vector<8xf32>
    %112 = vector.multi_reduction <add>, %109, %cst_58 [1] : vector<8x128xf32> to vector<8xf32>
    %113 = vector.shape_cast %112 : vector<8xf32> to vector<8x1xf32>
    %cst_59 = arith.constant 1.280000e+02 : f32
    %114 = vector.broadcast %cst_59 : f32 to vector<8x1xf32>
    %115 = arith.divf %113, %114 : vector<8x1xf32>
    %116 = vector.broadcast %115 : vector<8x1xf32> to vector<8x128xf32>
    %117 = arith.subf %109, %116 : vector<8x128xf32>
    %118 = arith.mulf %117, %117 : vector<8x128xf32>
    %cst_60 = arith.constant dense<0.000000e+00> : vector<8xf32>
    %119 = vector.multi_reduction <add>, %118, %cst_60 [1] : vector<8x128xf32> to vector<8xf32>
    %120 = vector.shape_cast %119 : vector<8xf32> to vector<8x1xf32>
    %cst_61 = arith.constant 1.280000e+02 : f32
    %121 = vector.broadcast %cst_61 : f32 to vector<8x1xf32>
    %122 = arith.divf %120, %121 : vector<8x1xf32>
    %123 = vector.broadcast %115 : vector<8x1xf32> to vector<8x128xf32>
    %124 = arith.subf %109, %123 : vector<8x128xf32>
    %cst_62 = arith.constant 9.99999974E-6 : f32
    %125 = vector.broadcast %cst_62 : f32 to vector<8x1xf32>
    %126 = arith.addf %122, %125 : vector<8x1xf32>
    %127 = math.rsqrt %126 : vector<8x1xf32>
    %128 = vector.broadcast %127 : vector<8x1xf32> to vector<8x128xf32>
    %129 = arith.mulf %124, %128 : vector<8x128xf32>
    %130 = vector.broadcast %110 : vector<1x128xf32> to vector<8x128xf32>
    %131 = arith.mulf %129, %130 : vector<8x128xf32>
    %132 = vector.broadcast %111 : vector<1x128xf32> to vector<8x128xf32>
    %133 = arith.addf %131, %132 : vector<8x128xf32>
    %c0_63 = arith.constant 0 : index
    %c0_64 = arith.constant 0 : index
    %134 = vector.load %arg11[%c0_63, %c0_64] : memref<128x256xbf16, #tpu.memory_space<vmem>>, vector<128x256xbf16>
    %135 = arith.truncf %133 : vector<8x128xf32> to vector<8x128xbf16>
    %cst_65 = arith.constant dense<0.000000e+00> : vector<8x256xf32>
    %136 = tpu.matmul %135, %134, %cst_65 {dimension_numbers = #tpu.dot_dimension_numbers<[1], [0], [0], [1], [0, 0, 1, 1], [], []>} : vector<8x128xbf16>, vector<128x256xbf16>, vector<8x256xf32> -> vector<8x256xf32>
    %c1 = arith.constant 1 : index
    %c0_66 = arith.constant 0 : index
    %137 = vector.load %arg8[%c1, %c0_66] : memref<5x512xf32, #tpu.memory_space<vmem>>, vector<1x256xf32>
    %138 = vector.broadcast %137 : vector<1x256xf32> to vector<8x256xf32>
    %139 = arith.addf %136, %138 : vector<8x256xf32>
    %cst_67 = arith.constant 0.000000e+00 : f32
    %140 = vector.broadcast %cst_67 : f32 to vector<8x256xf32>
    %141 = arith.maximumf %139, %140 : vector<8x256xf32>
    %c0_68 = arith.constant 0 : index
    %c0_69 = arith.constant 0 : index
    %142 = vector.load %arg12[%c0_68, %c0_69] : memref<256x128xbf16, #tpu.memory_space<vmem>>, vector<256x128xbf16>
    %143 = arith.truncf %141 : vector<8x256xf32> to vector<8x256xbf16>
    %cst_70 = arith.constant dense<0.000000e+00> : vector<8x128xf32>
    %144 = tpu.matmul %143, %142, %cst_70 {dimension_numbers = #tpu.dot_dimension_numbers<[1], [0], [0], [1], [0, 0, 1, 1], [], []>} : vector<8x256xbf16>, vector<256x128xbf16>, vector<8x128xf32> -> vector<8x128xf32>
    %c13 = arith.constant 13 : index
    %c0_71 = arith.constant 0 : index
    %145 = vector.load %arg7[%c13, %c0_71] : memref<19x128xf32, #tpu.memory_space<vmem>>, vector<1x128xf32>
    %146 = vector.broadcast %145 : vector<1x128xf32> to vector<8x128xf32>
    %147 = arith.addf %144, %146 : vector<8x128xf32>
    %148 = arith.addf %147, %133 : vector<8x128xf32>
    %c14 = arith.constant 14 : index
    %c0_72 = arith.constant 0 : index
    %149 = vector.load %arg7[%c14, %c0_72] : memref<19x128xf32, #tpu.memory_space<vmem>>, vector<1x128xf32>
    %c15 = arith.constant 15 : index
    %c0_73 = arith.constant 0 : index
    %150 = vector.load %arg7[%c15, %c0_73] : memref<19x128xf32, #tpu.memory_space<vmem>>, vector<1x128xf32>
    %cst_74 = arith.constant dense<0.000000e+00> : vector<8xf32>
    %151 = vector.multi_reduction <add>, %148, %cst_74 [1] : vector<8x128xf32> to vector<8xf32>
    %152 = vector.shape_cast %151 : vector<8xf32> to vector<8x1xf32>
    %cst_75 = arith.constant 1.280000e+02 : f32
    %153 = vector.broadcast %cst_75 : f32 to vector<8x1xf32>
    %154 = arith.divf %152, %153 : vector<8x1xf32>
    %155 = vector.broadcast %154 : vector<8x1xf32> to vector<8x128xf32>
    %156 = arith.subf %148, %155 : vector<8x128xf32>
    %157 = arith.mulf %156, %156 : vector<8x128xf32>
    %cst_76 = arith.constant dense<0.000000e+00> : vector<8xf32>
    %158 = vector.multi_reduction <add>, %157, %cst_76 [1] : vector<8x128xf32> to vector<8xf32>
    %159 = vector.shape_cast %158 : vector<8xf32> to vector<8x1xf32>
    %cst_77 = arith.constant 1.280000e+02 : f32
    %160 = vector.broadcast %cst_77 : f32 to vector<8x1xf32>
    %161 = arith.divf %159, %160 : vector<8x1xf32>
    %162 = vector.broadcast %154 : vector<8x1xf32> to vector<8x128xf32>
    %163 = arith.subf %148, %162 : vector<8x128xf32>
    %cst_78 = arith.constant 9.99999974E-6 : f32
    %164 = vector.broadcast %cst_78 : f32 to vector<8x1xf32>
    %165 = arith.addf %161, %164 : vector<8x1xf32>
    %166 = math.rsqrt %165 : vector<8x1xf32>
    %167 = vector.broadcast %166 : vector<8x1xf32> to vector<8x128xf32>
    %168 = arith.mulf %163, %167 : vector<8x128xf32>
    %169 = vector.broadcast %149 : vector<1x128xf32> to vector<8x128xf32>
    %170 = arith.mulf %168, %169 : vector<8x128xf32>
    %171 = vector.broadcast %150 : vector<1x128xf32> to vector<8x128xf32>
    %172 = arith.addf %170, %171 : vector<8x128xf32>
    %c0_79 = arith.constant 0 : index
    %c0_80 = arith.constant 0 : index
    %173 = vector.load %arg13[%c0_79, %c0_80] : memref<128x256xbf16, #tpu.memory_space<vmem>>, vector<128x256xbf16>
    %174 = arith.truncf %172 : vector<8x128xf32> to vector<8x128xbf16>
    %cst_81 = arith.constant dense<0.000000e+00> : vector<8x256xf32>
    %175 = tpu.matmul %174, %173, %cst_81 {dimension_numbers = #tpu.dot_dimension_numbers<[1], [0], [0], [1], [0, 0, 1, 1], [], []>} : vector<8x128xbf16>, vector<128x256xbf16>, vector<8x256xf32> -> vector<8x256xf32>
    %c2 = arith.constant 2 : index
    %c0_82 = arith.constant 0 : index
    %176 = vector.load %arg8[%c2, %c0_82] : memref<5x512xf32, #tpu.memory_space<vmem>>, vector<1x256xf32>
    %177 = vector.broadcast %176 : vector<1x256xf32> to vector<8x256xf32>
    %178 = arith.addf %175, %177 : vector<8x256xf32>
    %cst_83 = arith.constant 0.000000e+00 : f32
    %179 = vector.broadcast %cst_83 : f32 to vector<8x256xf32>
    %180 = arith.maximumf %178, %179 : vector<8x256xf32>
    %c0_84 = arith.constant 0 : index
    %c0_85 = arith.constant 0 : index
    %181 = vector.load %arg14[%c0_84, %c0_85] : memref<256x128xbf16, #tpu.memory_space<vmem>>, vector<256x128xbf16>
    %182 = arith.truncf %180 : vector<8x256xf32> to vector<8x256xbf16>
    %cst_86 = arith.constant dense<0.000000e+00> : vector<8x128xf32>
    %183 = tpu.matmul %182, %181, %cst_86 {dimension_numbers = #tpu.dot_dimension_numbers<[1], [0], [0], [1], [0, 0, 1, 1], [], []>} : vector<8x256xbf16>, vector<256x128xbf16>, vector<8x128xf32> -> vector<8x128xf32>
    %c16 = arith.constant 16 : index
    %c0_87 = arith.constant 0 : index
    %184 = vector.load %arg7[%c16, %c0_87] : memref<19x128xf32, #tpu.memory_space<vmem>>, vector<1x128xf32>
    %185 = vector.broadcast %184 : vector<1x128xf32> to vector<8x128xf32>
    %186 = arith.addf %183, %185 : vector<8x128xf32>
    %187 = arith.addf %186, %172 : vector<8x128xf32>
    %c17 = arith.constant 17 : index
    %c0_88 = arith.constant 0 : index
    %188 = vector.load %arg7[%c17, %c0_88] : memref<19x128xf32, #tpu.memory_space<vmem>>, vector<1x128xf32>
    %c18 = arith.constant 18 : index
    %c0_89 = arith.constant 0 : index
    %189 = vector.load %arg7[%c18, %c0_89] : memref<19x128xf32, #tpu.memory_space<vmem>>, vector<1x128xf32>
    %cst_90 = arith.constant dense<0.000000e+00> : vector<8xf32>
    %190 = vector.multi_reduction <add>, %187, %cst_90 [1] : vector<8x128xf32> to vector<8xf32>
    %191 = vector.shape_cast %190 : vector<8xf32> to vector<8x1xf32>
    %cst_91 = arith.constant 1.280000e+02 : f32
    %192 = vector.broadcast %cst_91 : f32 to vector<8x1xf32>
    %193 = arith.divf %191, %192 : vector<8x1xf32>
    %194 = vector.broadcast %193 : vector<8x1xf32> to vector<8x128xf32>
    %195 = arith.subf %187, %194 : vector<8x128xf32>
    %196 = arith.mulf %195, %195 : vector<8x128xf32>
    %cst_92 = arith.constant dense<0.000000e+00> : vector<8xf32>
    %197 = vector.multi_reduction <add>, %196, %cst_92 [1] : vector<8x128xf32> to vector<8xf32>
    %198 = vector.shape_cast %197 : vector<8xf32> to vector<8x1xf32>
    %cst_93 = arith.constant 1.280000e+02 : f32
    %199 = vector.broadcast %cst_93 : f32 to vector<8x1xf32>
    %200 = arith.divf %198, %199 : vector<8x1xf32>
    %201 = vector.broadcast %193 : vector<8x1xf32> to vector<8x128xf32>
    %202 = arith.subf %187, %201 : vector<8x128xf32>
    %cst_94 = arith.constant 9.99999974E-6 : f32
    %203 = vector.broadcast %cst_94 : f32 to vector<8x1xf32>
    %204 = arith.addf %200, %203 : vector<8x1xf32>
    %205 = math.rsqrt %204 : vector<8x1xf32>
    %206 = vector.broadcast %205 : vector<8x1xf32> to vector<8x128xf32>
    %207 = arith.mulf %202, %206 : vector<8x128xf32>
    %208 = vector.broadcast %188 : vector<1x128xf32> to vector<8x128xf32>
    %209 = arith.mulf %207, %208 : vector<8x128xf32>
    %210 = vector.broadcast %189 : vector<1x128xf32> to vector<8x128xf32>
    %211 = arith.addf %209, %210 : vector<8x128xf32>
    %c0_95 = arith.constant 0 : index
    %c0_96 = arith.constant 0 : index
    %212 = vector.load %arg22[%c0_95, %c0_96] : memref<8x256xf32, #tpu.memory_space<vmem>>, vector<8x128xf32>
    tpu.vector_store %arg22[%c0_95, %c0_96], %211 {strides = array<i32>} : memref<8x256xf32, #tpu.memory_space<vmem>>, vector<8x128xf32>,
    %c0_97 = arith.constant 0 : index
    %c0_98 = arith.constant 0 : index
    %213 = vector.load %arg23[%c0_97, %c0_98] : memref<8x128xf32, #tpu.memory_space<vmem>>, vector<8x128xf32>
    %c0_99 = arith.constant 0 : index
    %c128 = arith.constant 128 : index
    %214 = vector.load %arg22[%c0_99, %c128] : memref<8x256xf32, #tpu.memory_space<vmem>>, vector<8x128xf32>
    tpu.vector_store %arg22[%c0_99, %c128], %213 {strides = array<i32>} : memref<8x256xf32, #tpu.memory_space<vmem>>, vector<8x128xf32>,
    %c0_100 = arith.constant 0 : index
    %c0_101 = arith.constant 0 : index
    %215 = vector.load %arg22[%c0_100, %c0_101] : memref<8x256xf32, #tpu.memory_space<vmem>>, vector<8x256xf32>
    %c0_102 = arith.constant 0 : index
    %c0_103 = arith.constant 0 : index
    %216 = vector.load %arg15[%c0_102, %c0_103] : memref<256x512xbf16, #tpu.memory_space<vmem>>, vector<256x512xbf16>
    %217 = arith.truncf %215 : vector<8x256xf32> to vector<8x256xbf16>
    %cst_104 = arith.constant dense<0.000000e+00> : vector<8x512xf32>
    %218 = tpu.matmul %217, %216, %cst_104 {dimension_numbers = #tpu.dot_dimension_numbers<[1], [0], [0], [1], [0, 0, 1, 1], [], []>} : vector<8x256xbf16>, vector<256x512xbf16>, vector<8x512xf32> -> vector<8x512xf32>
    %c3 = arith.constant 3 : index
    %c0_105 = arith.constant 0 : index
    %219 = vector.load %arg8[%c3, %c0_105] : memref<5x512xf32, #tpu.memory_space<vmem>>, vector<1x512xf32>
    %220 = vector.broadcast %219 : vector<1x512xf32> to vector<8x512xf32>
    %221 = arith.addf %218, %220 : vector<8x512xf32>
    %222 = vector.extract_strided_slice %221 {offsets = [0, 0], sizes = [8, 128], strides = [1, 1]} : vector<8x512xf32> to vector<8x128xf32>
    %cst_106 = arith.constant 5.000000e-01 : f32
    %223 = vector.broadcast %cst_106 : f32 to vector<8x128xf32>
    %224 = arith.mulf %223, %222 : vector<8x128xf32>
    %225 = math.tanh %224 : vector<8x128xf32>
    %cst_107 = arith.constant 1.000000e+00 : f32
    %226 = vector.broadcast %cst_107 : f32 to vector<8x128xf32>
    %227 = arith.addf %225, %226 : vector<8x128xf32>
    %cst_108 = arith.constant 5.000000e-01 : f32
    %228 = vector.broadcast %cst_108 : f32 to vector<8x128xf32>
    %229 = arith.mulf %228, %227 : vector<8x128xf32>
    %230 = vector.extract_strided_slice %221 {offsets = [0, 128], sizes = [8, 128], strides = [1, 1]} : vector<8x512xf32> to vector<8x128xf32>
    %cst_109 = arith.constant 5.000000e-01 : f32
    %231 = vector.broadcast %cst_109 : f32 to vector<8x128xf32>
    %232 = arith.mulf %231, %230 : vector<8x128xf32>
    %233 = math.tanh %232 : vector<8x128xf32>
    %cst_110 = arith.constant 1.000000e+00 : f32
    %234 = vector.broadcast %cst_110 : f32 to vector<8x128xf32>
    %235 = arith.addf %233, %234 : vector<8x128xf32>
    %cst_111 = arith.constant 5.000000e-01 : f32
    %236 = vector.broadcast %cst_111 : f32 to vector<8x128xf32>
    %237 = arith.mulf %236, %235 : vector<8x128xf32>
    %238 = vector.extract_strided_slice %221 {offsets = [0, 256], sizes = [8, 128], strides = [1, 1]} : vector<8x512xf32> to vector<8x128xf32>
    %239 = math.tanh %238 : vector<8x128xf32>
    %240 = vector.extract_strided_slice %221 {offsets = [0, 384], sizes = [8, 128], strides = [1, 1]} : vector<8x512xf32> to vector<8x128xf32>
    %cst_112 = arith.constant 5.000000e-01 : f32
    %241 = vector.broadcast %cst_112 : f32 to vector<8x128xf32>
    %242 = arith.mulf %241, %240 : vector<8x128xf32>
    %243 = math.tanh %242 : vector<8x128xf32>
    %cst_113 = arith.constant 1.000000e+00 : f32
    %244 = vector.broadcast %cst_113 : f32 to vector<8x128xf32>
    %245 = arith.addf %243, %244 : vector<8x128xf32>
    %cst_114 = arith.constant 5.000000e-01 : f32
    %246 = vector.broadcast %cst_114 : f32 to vector<8x128xf32>
    %247 = arith.mulf %246, %245 : vector<8x128xf32>
    %c0_115 = arith.constant 0 : index
    %c0_116 = arith.constant 0 : index
    %248 = vector.load %arg24[%c0_115, %c0_116] : memref<8x128xf32, #tpu.memory_space<vmem>>, vector<8x128xf32>
    %249 = arith.mulf %237, %248 : vector<8x128xf32>
    %250 = arith.mulf %229, %239 : vector<8x128xf32>
    %251 = arith.addf %249, %250 : vector<8x128xf32>
    %252 = math.tanh %251 : vector<8x128xf32>
    %253 = arith.mulf %247, %252 : vector<8x128xf32>
    %c0_117 = arith.constant 0 : index
    %c0_118 = arith.constant 0 : index
    %254 = vector.load %arg23[%c0_117, %c0_118] : memref<8x128xf32, #tpu.memory_space<vmem>>, vector<8x128xf32>
    tpu.vector_store %arg23[%c0_117, %c0_118], %253 {strides = array<i32>} : memref<8x128xf32, #tpu.memory_space<vmem>>, vector<8x128xf32>,
    %c0_119 = arith.constant 0 : index
    %c0_120 = arith.constant 0 : index
    %255 = vector.load %arg24[%c0_119, %c0_120] : memref<8x128xf32, #tpu.memory_space<vmem>>, vector<8x128xf32>
    tpu.vector_store %arg24[%c0_119, %c0_120], %251 {strides = array<i32>} : memref<8x128xf32, #tpu.memory_space<vmem>>, vector<8x128xf32>,
    %c0_121 = arith.constant 0 : index
    %c0_122 = arith.constant 0 : index
    %256 = vector.load %arg18[%c0_121, %c0_122] : memref<8x128xf32, #tpu.memory_space<vmem>>, vector<8x128xf32>
    tpu.vector_store %arg18[%c0_121, %c0_122], %253 {strides = array<i32>} : memref<8x128xf32, #tpu.memory_space<vmem>>, vector<8x128xf32>,
    %c0_123 = arith.constant 0 : index
    %c0_124 = arith.constant 0 : index
    %257 = vector.load %arg19[%c0_123, %c0_124] : memref<8x128xf32, #tpu.memory_space<vmem>>, vector<8x128xf32>
    tpu.vector_store %arg19[%c0_123, %c0_124], %251 {strides = array<i32>} : memref<8x128xf32, #tpu.memory_space<vmem>>, vector<8x128xf32>,
    %c0_125 = arith.constant 0 : index
    %c0_126 = arith.constant 0 : index
    %258 = vector.load %arg16[%c0_125, %c0_126] : memref<128x128xbf16, #tpu.memory_space<vmem>>, vector<128x128xbf16>
    %259 = arith.truncf %253 : vector<8x128xf32> to vector<8x128xbf16>
    %cst_127 = arith.constant dense<0.000000e+00> : vector<8x128xf32>
    %260 = tpu.matmul %259, %258, %cst_127 {dimension_numbers = #tpu.dot_dimension_numbers<[1], [0], [0], [1], [0, 0, 1, 1], [], []>} : vector<8x128xbf16>, vector<128x128xbf16>, vector<8x128xf32> -> vector<8x128xf32>
    %c4_128 = arith.constant 4 : index
    %c0_129 = arith.constant 0 : index
    %261 = vector.load %arg8[%c4_128, %c0_129] : memref<5x512xf32, #tpu.memory_space<vmem>>, vector<1x128xf32>
    %262 = vector.broadcast %261 : vector<1x128xf32> to vector<8x128xf32>
    %263 = arith.addf %260, %262 : vector<8x128xf32>
    %264 = arith.cmpf one, %263, %263 : vector<8x128xf32>
    %cst_130 = arith.constant 0.000000e+00 : f32
    %265 = vector.broadcast %cst_130 : f32 to vector<8x128xf32>
    %266 = arith.select %264, %265, %263 : vector<8x128xi1>, vector<8x128xf32>
    %cst_131 = arith.constant dense<0xFF800000> : vector<8xf32>
    %267 = vector.multi_reduction <maximumf>, %266, %cst_131 [1] : vector<8x128xf32> to vector<8xf32>
    %268 = vector.shape_cast %267 : vector<8xf32> to vector<8x1xf32>
    %269 = vector.broadcast %268 : vector<8x1xf32> to vector<8x128xf32>
    %270 = arith.subf %266, %269 : vector<8x128xf32>
    %271 = math.exp %270 : vector<8x128xf32>
    %cst_132 = arith.constant dense<0.000000e+00> : vector<8xf32>
    %272 = vector.multi_reduction <add>, %271, %cst_132 [1] : vector<8x128xf32> to vector<8xf32>
    %273 = vector.shape_cast %272 : vector<8xf32> to vector<8x1xf32>
    %274 = vector.broadcast %273 : vector<8x1xf32> to vector<8x128xf32>
    %275 = arith.divf %271, %274 : vector<8x128xf32>
    %c0_133 = arith.constant 0 : index
    %c0_134 = arith.constant 0 : index
    %c0_135 = arith.constant 0 : index
    %276 = vector.load %arg17[%c0_133, %c0_134, %c0_135] : memref<1x8x128xf32, #tpu.memory_space<vmem>>, vector<1x8x128xf32>
    %277 = vector.shape_cast %276 : vector<1x8x128xf32> to vector<8x128xf32>
    %278 = vector.shape_cast %275 : vector<8x128xf32> to vector<1x8x128xf32>
    tpu.vector_store %arg17[%c0_133, %c0_134, %c0_135], %278 {strides = array<i32>} : memref<1x8x128xf32, #tpu.memory_space<vmem>>, vector<1x8x128xf32>,
    return
  }
  func.func @transform_0(%arg0: i32) -> (i32, i32, i32) {
    %c0_i32 = arith.constant 0 : i32
    %c0_i32_0 = arith.constant 0 : i32
    %c0_i32_1 = arith.constant 0 : i32
    return %arg0, %c0_i32, %c0_i32_0 : i32, i32, i32
  }
  func.func @transform_1(%arg0: i32) -> (i32, i32, i32) {
    %c0_i32 = arith.constant 0 : i32
    %c0_i32_0 = arith.constant 0 : i32
    %c0_i32_1 = arith.constant 0 : i32
    return %arg0, %c0_i32, %c0_i32_0 : i32, i32, i32
  }
  func.func @transform_2(%arg0: i32) -> (i32, i32) {
    %c0_i32 = arith.constant 0 : i32
    %c0_i32_0 = arith.constant 0 : i32
    %c0_i32_1 = arith.constant 0 : i32
    return %c0_i32, %c0_i32_0 : i32, i32
  }
  func.func @transform_3(%arg0: i32) -> (i32, i32) {
    %c0_i32 = arith.constant 0 : i32
    %c0_i32_0 = arith.constant 0 : i32
    %c0_i32_1 = arith.constant 0 : i32
    return %c0_i32, %c0_i32_0 : i32, i32
  }
  func.func @transform_4(%arg0: i32) -> (i32, i32) {
    %c0_i32 = arith.constant 0 : i32
    %c0_i32_0 = arith.constant 0 : i32
    %c0_i32_1 = arith.constant 0 : i32
    return %c0_i32, %c0_i32_0 : i32, i32
  }
  func.func @transform_5(%arg0: i32) -> (i32, i32) {
    %c0_i32 = arith.constant 0 : i32
    %c0_i32_0 = arith.constant 0 : i32
    %c0_i32_1 = arith.constant 0 : i32
    return %c0_i32, %c0_i32_0 : i32, i32
  }
  func.func @transform_6(%arg0: i32) -> (i32, i32) {
    %c0_i32 = arith.constant 0 : i32
    %c0_i32_0 = arith.constant 0 : i32
    %c0_i32_1 = arith.constant 0 : i32
    return %c0_i32, %c0_i32_0 : i32, i32
  }
  func.func @transform_7(%arg0: i32) -> (i32, i32) {
    %c0_i32 = arith.constant 0 : i32
    %c0_i32_0 = arith.constant 0 : i32
    %c0_i32_1 = arith.constant 0 : i32
    return %c0_i32, %c0_i32_0 : i32, i32
  }
  func.func @transform_8(%arg0: i32) -> (i32, i32) {
    %c0_i32 = arith.constant 0 : i32
    %c0_i32_0 = arith.constant 0 : i32
    %c0_i32_1 = arith.constant 0 : i32
    return %c0_i32, %c0_i32_0 : i32, i32
  }
  func.func @transform_9(%arg0: i32) -> (i32, i32) {
    %c0_i32 = arith.constant 0 : i32
    %c0_i32_0 = arith.constant 0 : i32
    %c0_i32_1 = arith.constant 0 : i32
    return %c0_i32, %c0_i32_0 : i32, i32
  }
  func.func @transform_10(%arg0: i32) -> (i32, i32) {
    %c0_i32 = arith.constant 0 : i32
    %c0_i32_0 = arith.constant 0 : i32
    %c0_i32_1 = arith.constant 0 : i32
    return %c0_i32, %c0_i32_0 : i32, i32
  }
  func.func @transform_11(%arg0: i32) -> (i32, i32) {
    %c0_i32 = arith.constant 0 : i32
    %c0_i32_0 = arith.constant 0 : i32
    %c0_i32_1 = arith.constant 0 : i32
    return %c0_i32, %c0_i32_0 : i32, i32
  }
  func.func @transform_12(%arg0: i32) -> (i32, i32) {
    %c0_i32 = arith.constant 0 : i32
    %c0_i32_0 = arith.constant 0 : i32
    %c0_i32_1 = arith.constant 0 : i32
    return %c0_i32, %c0_i32_0 : i32, i32
  }
  func.func @transform_13(%arg0: i32) -> (i32, i32) {
    %c0_i32 = arith.constant 0 : i32
    %c0_i32_0 = arith.constant 0 : i32
    %c0_i32_1 = arith.constant 0 : i32
    return %c0_i32, %c0_i32_0 : i32, i32
  }
  func.func @transform_14(%arg0: i32) -> (i32, i32) {
    %c0_i32 = arith.constant 0 : i32
    %c0_i32_0 = arith.constant 0 : i32
    %c0_i32_1 = arith.constant 0 : i32
    return %c0_i32, %c0_i32_0 : i32, i32
  }
  func.func @transform_15(%arg0: i32) -> (i32, i32) {
    %c0_i32 = arith.constant 0 : i32
    %c0_i32_0 = arith.constant 0 : i32
    %c0_i32_1 = arith.constant 0 : i32
    return %c0_i32, %c0_i32_0 : i32, i32
  }
  func.func @transform_16(%arg0: i32) -> (i32, i32, i32) {
    %c0_i32 = arith.constant 0 : i32
    %c0_i32_0 = arith.constant 0 : i32
    %c0_i32_1 = arith.constant 0 : i32
    return %arg0, %c0_i32, %c0_i32_0 : i32, i32, i32
  }
  func.func @transform_17(%arg0: i32) -> (i32, i32) {
    %c0_i32 = arith.constant 0 : i32
    %c0_i32_0 = arith.constant 0 : i32
    %c0_i32_1 = arith.constant 0 : i32
    return %c0_i32, %c0_i32_0 : i32, i32
  }
  func.func @transform_18(%arg0: i32) -> (i32, i32) {
    %c0_i32 = arith.constant 0 : i32
    %c0_i32_0 = arith.constant 0 : i32
    %c0_i32_1 = arith.constant 0 : i32
    return %c0_i32, %c0_i32_0 : i32, i32
  }
}

</mosaic_0001>

<bundles_post_ra>
// kernel: actor_forward.1
= control target key start
LH: loop header
LB: loop body
LE: loop exit
PB: predicated region body
PF: predicated region fallthrough
CT: control target
= control target key end

     0   :  { %s4265_s0 = inlined_call_operand.vmem [shape: f32[1,4,16], index: 0, kind: input, shape index: {}]   ;;  %s4266_s1 = inlined_call_operand.vmem [shape: f32[1,4,16], index: 1, kind: input, shape index: {}]   ;;  %s4267_s2 = inlined_call_operand.vmem [shape: f32[8,128], index: 2, kind: input, shape index: {}]   ;;  %s4268_s3 = inlined_call_operand.vmem [shape: f32[8,128], index: 3, kind: input, shape index: {}]   ;;  %s4269_s4 = inlined_call_operand.hbm [shape: bf16[16,128], index: 4, kind: input, shape index: {}]   ;;  %s4270_s5 = inlined_call_operand.hbm [shape: bf16[16,128], index: 5, kind: input, shape index: {}]   ;;  %s4271_s6 = inlined_call_operand.hbm [shape: f32[19,128], index: 6, kind: input, shape index: {}]   ;;  %s4272_s7 = inlined_call_operand.vmem [shape: f32[5,512], index: 7, kind: input, shape index: {}]   ;;  %s4273_s8 = inlined_call_operand.hbm [shape: bf16[128,384], index: 8, kind: input, shape index: {}]   ;;  %s4274_s9 = inlined_call_operand.hbm [shape: bf16[128,128], index: 9, kind: input, shape index: {}]   ;;  %s4275_s10 = inlined_call_operand.hbm [shape: bf16[128,256], index: 10, kind: input, shape index: {}]   ;;  %s4276_s11 = inlined_call_operand.hbm [shape: bf16[256,128], index: 11, kind: input, shape index: {}]   ;;  %s4277_s12 = inlined_call_operand.hbm [shape: bf16[128,256], index: 12, kind: input, shape index: {}]   ;;  %s4278_s13 = inlined_call_operand.hbm [shape: bf16[256,128], index: 13, kind: input, shape index: {}]   ;;  %s4279_s14 = inlined_call_operand.hbm [shape: bf16[256,512], index: 14, kind: input, shape index: {}]   ;;  %s4280_s15 = inlined_call_operand.hbm [shape: bf16[128,128], index: 15, kind: input, shape index: {}]   ;;  %s4281_s16 = inlined_call_operand.vmem [shape: f32[1,8,128], index: 16, kind: output, shape index: {0}]   ;;  %s4282_s17 = inlined_call_operand.hbm [shape: f32[8,128], index: 17, kind: output, shape index: {1}]   ;;  %s4283_s18 = inlined_call_operand.hbm [shape: f32[8,128], index: 18, kind: output, shape index: {2}]  }
   0x1   :  { %4288 = sst [smem:[#allocation36_spill]] %s4265_s0 }
   0x2   :  { %4289 = sst [smem:[#allocation37_spill]] %s4266_s1 }
   0x3   :  { %4290 = sst [smem:[#allocation38_spill]] %s4267_s2 }
   0x4   :  { %24 = vsyncpa [#allocation8], 0 }
   0x5   :  { %25 = vsyncpa [#allocation11], 0 }
   0x6   :  { %26 = vsyncpa [#allocation14], 0 }
   0x7   :  { %27 = vsyncpa [#allocation17], 0 }
   0x8   :  { %28 = vsyncpa [#allocation20], 0 }
   0x9   :  { %29 = vsyncpa [#allocation23], 0 }
   0xa   :  { %30 = vsyncpa [#allocation9], 0 }
   0xb   :  { %31 = vsyncpa [#allocation27], 0  ;;  %s3784_s27 = smov [#allocation10]   ;;  %s3785_s29 = smov [#allocation13]  }
   0xc   :  { %s57_s28 = sshll.u32 %s3784_s27, 4  ;;  %s83_s30 = sshll.u32 %s3785_s29, 4  ;;  %s58_s28 = int_to_ptr.vmem [resolvable:$true] %s57_s28  ;;  %s3905_s30 = int_to_ptr.vmem [resolvable:$true] %s83_s30 }
   0xd   :  { %s3482_s1 = scalar_lea.hbm %s4270_s5, 128 }
   0xe   :  { %p3483_p0 = scmp.ne.s32.totalorder %s4270_s5, %s3482_s1  ;;  %p3486_p1 = scmp.lt.u32.totalorder %s3482_s1, %s4270_s5 }
  0x10   :  { %p3488_p2 = pnand %p3486_p1, %p3483_p0 }
  0x12   :  { %3491 = shalt.err (!%p3488_p2)
}
  0x13   :  { %s3492_s23 = scalar_lea.vmem %s58_s28, 128  ;;  %p3497_p4 = scmp.lt.s32.totalorder %s58_s28, %s58_s28 }
  0x14   :  { %p3493_p3 = scmp.ne.s32.totalorder %s58_s28, %s3492_s23  ;;  %p3498_p5 = scmp.lt.s32.totalorder %s3492_s23, %s3492_s23 }
  0x16   :  { %p3499_p6 = por %p3498_p5, %p3497_p4 }
  0x18   :  { %p3500_p7 = pnand %p3499_p6, %p3493_p3 }
  0x1a   :  { %3503 = shalt.err (!%p3500_p7)
}
  0x1b   :  { %s4284_s24 = smov 64   ;;  %s4286_s25 = smov 4  }
  0x1c   :  { %63 = dma.hbm_to_vmem [thread:$0]  %s4270_s5, 128, %s58_s28, [#allocation11], %s4284_s24, %s4284_s24, %s4286_s25  }
  0x1d   :  { %s3504_s19 = scalar_lea.hbm %s4273_s8, 3072 }
  0x1e   :  { %p3505_p8 = scmp.ne.s32.totalorder %s4273_s8, %s3504_s19  ;;  %p3508_p9 = scmp.lt.u32.totalorder %s3504_s19, %s4273_s8 }
  0x20   :  { %p3510_p10 = pnand %p3508_p9, %p3505_p8 }
  0x22   :  { %3513 = shalt.err (!%p3510_p10)
}
  0x23   :  { %s3514_s2 = scalar_lea.vmem %s3905_s30, 3072  ;;  %p3519_p12 = scmp.lt.s32.totalorder %s3905_s30, %s3905_s30 }
  0x24   :  { %p3515_p11 = scmp.ne.s32.totalorder %s3905_s30, %s3514_s2  ;;  %p3520_p13 = scmp.lt.s32.totalorder %s3514_s2, %s3514_s2 }
  0x26   :  { %p3521_p0 = por %p3520_p13, %p3519_p12 }
  0x28   :  { %p3522_p1 = pnand %p3521_p0, %p3515_p11 }
  0x2a   :  { %3525 = shalt.err (!%p3522_p1)
}
  0x2b   :  { %s3788_s5 = smov 192   ;;  %s3789_s28 = smov 12  }
  0x2c   :  { %89 = dma.hbm_to_vmem [thread:$0]  %s4273_s8, 3072, %s3905_s30, [#allocation14], %s3788_s5, %s3788_s5, %s3789_s28  }
  0x2d   :  { %s3790_s27 = smov [#allocation16]   ;;  %s3791_s0 = smov [#allocation19]  }
  0x2e   :  { %s107_s29 = sshll.u32 %s3790_s27, 4  ;;  %s131_s19 = sshll.u32 %s3791_s0, 4  ;;  %s108_s29 = int_to_ptr.vmem [resolvable:$true] %s107_s29  ;;  %s3939_s19 = int_to_ptr.vmem [resolvable:$true] %s131_s19 }
  0x2f   :  { %s3526_s21 = scalar_lea.hbm %s4275_s10, 2048 }
  0x30   :  { %p3527_p2 = scmp.ne.s32.totalorder %s4275_s10, %s3526_s21  ;;  %p3530_p3 = scmp.lt.u32.totalorder %s3526_s21, %s4275_s10 }
  0x32   :  { %p3532_p4 = pnand %p3530_p3, %p3527_p2 }
  0x34   :  { %3535 = shalt.err (!%p3532_p4)
}
  0x35   :  { %s3536_s8 = scalar_lea.vmem %s108_s29, 2048  ;;  %p3541_p6 = scmp.lt.s32.totalorder %s108_s29, %s108_s29 }
  0x36   :  { %p3537_p5 = scmp.ne.s32.totalorder %s108_s29, %s3536_s8  ;;  %p3542_p7 = scmp.lt.s32.totalorder %s3536_s8, %s3536_s8 }
  0x38   :  { %p3543_p8 = por %p3542_p7, %p3541_p6 }
  0x3a   :  { %p3544_p9 = pnand %p3543_p8, %p3537_p5 }
  0x3c   :  { %3547 = shalt.err (!%p3544_p9)
}
  0x3d   :  { %s3792_s30 = smov 128   ;;  %s3793_s5 = smov 8  }
  0x3e   :  { %113 = dma.hbm_to_vmem [thread:$0]  %s4275_s10, 2048, %s108_s29, [#allocation17], %s3792_s30, %s3792_s30, %s3793_s5  }
  0x3f   :  { %s3548_s26 = scalar_lea.hbm %s4277_s12, 2048 }
  0x40   :  { %p3549_p10 = scmp.ne.s32.totalorder %s4277_s12, %s3548_s26  ;;  %p3552_p11 = scmp.lt.u32.totalorder %s3548_s26, %s4277_s12 }
  0x42   :  { %p3554_p12 = pnand %p3552_p11, %p3549_p10 }
  0x44   :  { %3557 = shalt.err (!%p3554_p12)
}
  0x45   :  { %s3558_s21 = scalar_lea.vmem %s3939_s19, 2048  ;;  %p3563_p0 = scmp.lt.s32.totalorder %s3939_s19, %s3939_s19 }
  0x46   :  { %p3559_p13 = scmp.ne.s32.totalorder %s3939_s19, %s3558_s21  ;;  %p3564_p1 = scmp.lt.s32.totalorder %s3558_s21, %s3558_s21 }
  0x48   :  { %p3565_p2 = por %p3564_p1, %p3563_p0 }
  0x4a   :  { %p3566_p3 = pnand %p3565_p2, %p3559_p13 }
  0x4c   :  { %3569 = shalt.err (!%p3566_p3)
}
  0x4d   :  { %137 = dma.hbm_to_vmem [thread:$0]  %s4277_s12, 2048, %s3939_s19, [#allocation20], %s3792_s30, %s3792_s30, %s3793_s5  }
  0x4e   :  { %s3794_s22 = smov [#allocation22]   ;;  %s3570_s23 = scalar_lea.hbm %s4279_s14, 8192 }
  0x4f   :  { %s155_s2 = sshll.u32 %s3794_s22, 4  ;;  %p3571_p4 = scmp.ne.s32.totalorder %s4279_s14, %s3570_s23  ;;  %s156_s2 = int_to_ptr.vmem [resolvable:$true] %s155_s2 }
  0x50   :  { %p3574_p5 = scmp.lt.u32.totalorder %s3570_s23, %s4279_s14 }
  0x52   :  { %p3576_p6 = pnand %p3574_p5, %p3571_p4 }
  0x54   :  { %3579 = shalt.err (!%p3576_p6)
}
  0x55   :  { %s3580_s0 = scalar_lea.vmem %s156_s2, 8192  ;;  %p3585_p8 = scmp.lt.s32.totalorder %s156_s2, %s156_s2 }
  0x56   :  { %p3581_p7 = scmp.ne.s32.totalorder %s156_s2, %s3580_s0  ;;  %p3586_p9 = scmp.lt.s32.totalorder %s3580_s0, %s3580_s0 }
  0x58   :  { %p3587_p10 = por %p3586_p9, %p3585_p8 }
  0x5a   :  { %p3588_p11 = pnand %p3587_p10, %p3581_p7 }
  0x5c   :  { %3591 = shalt.err (!%p3588_p11)
}
  0x5d   :  { %s3795_s12 = smov 256   ;;  %s3796_s19 = smov 16  }
  0x5e   :  { %161 = dma.hbm_to_vmem [thread:$0]  %s4279_s14, 8192, %s156_s2, [#allocation23], %s3795_s12, %s3795_s12, %s3796_s19  }
  0x5f   :  { %s3797_s21 = smov [#allocation7]   ;;  %s3798_s29 = smov [#allocation12]  }
  0x60   :  { %s45_s10 = sshll.u32 %s3797_s21, 4  ;;  %s69_s22 = sshll.u32 %s3798_s29, 4  ;;  %s46_s10 = int_to_ptr.vmem [resolvable:$true] %s45_s10  ;;  %s70_s22 = int_to_ptr.vmem [resolvable:$true] %s69_s22 }
  0x61   :  { %s3592_s23 = scalar_lea.hbm %s4269_s4, 128 }
  0x62   :  { %p3593_p12 = scmp.ne.s32.totalorder %s4269_s4, %s3592_s23  ;;  %p3596_p13 = scmp.lt.u32.totalorder %s3592_s23, %s4269_s4 }
  0x64   :  { %p3598_p0 = pnand %p3596_p13, %p3593_p12 }
  0x66   :  { %3601 = shalt.err (!%p3598_p0)
}
  0x67   :  { %s3602_s14 = scalar_lea.vmem %s46_s10, 128  ;;  %p3607_p2 = scmp.lt.s32.totalorder %s46_s10, %s46_s10 }
  0x68   :  { %p3603_p1 = scmp.ne.s32.totalorder %s46_s10, %s3602_s14  ;;  %p3608_p3 = scmp.lt.s32.totalorder %s3602_s14, %s3602_s14 }
  0x6a   :  { %p3609_p4 = por %p3608_p3, %p3607_p2 }
  0x6c   :  { %p3610_p5 = pnand %p3609_p4, %p3603_p1 }
  0x6e   :  { %3613 = shalt.err (!%p3610_p5)
}
  0x6f   :  { %s4291_s2 = smov 4   ;;  %s4292_s0 = smov 64  }
  0x70   :  { %51 = dma.hbm_to_vmem [thread:$0]  %s4269_s4, 128, %s46_s10, [#allocation8], %s4292_s0, %s4292_s0, %s4291_s2  }
  0x71   :  { %s3614_s21 = scalar_lea.hbm %s4271_s6, 384 }
  0x72   :  { %p3615_p6 = scmp.ne.s32.totalorder %s4271_s6, %s3614_s21  ;;  %p3618_p7 = scmp.lt.u32.totalorder %s3614_s21, %s4271_s6 }
  0x74   :  { %p3620_p8 = pnand %p3618_p7, %p3615_p6 }
  0x76   :  { %3623 = shalt.err (!%p3620_p8)
}
  0x77   :  { %s3624_s24 = scalar_lea.vmem %s70_s22, 384  ;;  %p3629_p10 = scmp.lt.s32.totalorder %s70_s22, %s70_s22 }
  0x78   :  { %p3625_p9 = scmp.ne.s32.totalorder %s70_s22, %s3624_s24  ;;  %p3630_p11 = scmp.lt.s32.totalorder %s3624_s24, %s3624_s24 }
  0x7a   :  { %p3631_p12 = por %p3630_p11, %p3629_p10 }
  0x7c   :  { %p3632_p13 = pnand %p3631_p12, %p3625_p9 }
  0x7e   :  { %3635 = shalt.err (!%p3632_p13)
}
  0x7f   :  { %75 = dma.hbm_to_vmem [thread:$0]  %s4271_s6, 384, %s70_s22, [#allocation11], %s3792_s30, %s3792_s30, %s3793_s5  }
  0x80   :  { %s3799_s25 = smov [#allocation15]   ;;  %s3800_s27 = smov [#allocation18]  }
  0x81   :  { %s95_s26 = sshll.u32 %s3799_s25, 4  ;;  %s119_s14 = sshll.u32 %s3800_s27, 4  ;;  %s96_s26 = int_to_ptr.vmem [resolvable:$true] %s95_s26  ;;  %s120_s14 = int_to_ptr.vmem [resolvable:$true] %s119_s14 }
  0x82   :  { %s3636_s1 = scalar_lea.hbm %s4274_s9, 1024 }
  0x83   :  { %p3637_p0 = scmp.ne.s32.totalorder %s4274_s9, %s3636_s1  ;;  %p3640_p1 = scmp.lt.u32.totalorder %s3636_s1, %s4274_s9 }
  0x85   :  { %p3642_p2 = pnand %p3640_p1, %p3637_p0 }
  0x87   :  { %3645 = shalt.err (!%p3642_p2)
}
  0x88   :  { %s3646_s6 = scalar_lea.vmem %s96_s26, 1024  ;;  %p3651_p4 = scmp.lt.s32.totalorder %s96_s26, %s96_s26 }
  0x89   :  { %p3647_p3 = scmp.ne.s32.totalorder %s96_s26, %s3646_s6  ;;  %p3652_p5 = scmp.lt.s32.totalorder %s3646_s6, %s3646_s6 }
  0x8b   :  { %p3653_p6 = por %p3652_p5, %p3651_p4 }
  0x8d   :  { %p3654_p7 = pnand %p3653_p6, %p3647_p3 }
  0x8f   :  { %3657 = shalt.err (!%p3654_p7)
}
  0x90   :  { %101 = dma.hbm_to_vmem [thread:$0]  %s4274_s9, 1024, %s96_s26, [#allocation14], %s4292_s0, %s4292_s0, %s4291_s2  }
  0x91   :  { %s3658_s23 = scalar_lea.hbm %s4276_s11, 2048 }
  0x92   :  { %p3659_p8 = scmp.ne.s32.totalorder %s4276_s11, %s3658_s23  ;;  %p3662_p9 = scmp.lt.u32.totalorder %s3658_s23, %s4276_s11 }
  0x94   :  { %p3664_p10 = pnand %p3662_p9, %p3659_p8 }
  0x96   :  { %3667 = shalt.err (!%p3664_p10)
}
  0x97   :  { %s3668_s27 = scalar_lea.vmem %s120_s14, 2048  ;;  %p3673_p12 = scmp.lt.s32.totalorder %s120_s14, %s120_s14 }
  0x98   :  { %p3669_p11 = scmp.ne.s32.totalorder %s120_s14, %s3668_s27  ;;  %p3674_p13 = scmp.lt.s32.totalorder %s3668_s27, %s3668_s27 }
  0x9a   :  { %p3675_p0 = por %p3674_p13, %p3673_p12 }
  0x9c   :  { %p3676_p1 = pnand %p3675_p0, %p3669_p11 }
  0x9e   :  { %3679 = shalt.err (!%p3676_p1)
}
  0x9f   :  { %125 = dma.hbm_to_vmem [thread:$0]  %s4276_s11, 2048, %s120_s14, [#allocation17], %s4292_s0, %s4292_s0, %s4291_s2  }
  0xa0   :  { %s3801_s12 = smov [#allocation21]   ;;  %s3802_s1 = smov [#allocation24]  }
  0xa1   :  { %s143_s19 = sshll.u32 %s3801_s12, 4  ;;  %s167_s20 = sshll.u32 %s3802_s1, 4  ;;  %s144_s19 = int_to_ptr.vmem [resolvable:$true] %s143_s19  ;;  %s168_s20 = int_to_ptr.vmem [resolvable:$true] %s167_s20 }
  0xa2   :  { %s3680_s8 = scalar_lea.hbm %s4278_s13, 2048 }
  0xa3   :  { %p3681_p2 = scmp.ne.s32.totalorder %s4278_s13, %s3680_s8  ;;  %p3684_p3 = scmp.lt.u32.totalorder %s3680_s8, %s4278_s13 }
  0xa5   :  { %p3686_p4 = pnand %p3684_p3, %p3681_p2 }
  0xa7   :  { %3689 = shalt.err (!%p3686_p4)
}
  0xa8   :  { %s3690_s11 = scalar_lea.vmem %s144_s19, 2048  ;;  %p3695_p6 = scmp.lt.s32.totalorder %s144_s19, %s144_s19 }
  0xa9   :  { %p3691_p5 = scmp.ne.s32.totalorder %s144_s19, %s3690_s11  ;;  %p3696_p7 = scmp.lt.s32.totalorder %s3690_s11, %s3690_s11 }
  0xab   :  { %p3697_p8 = por %p3696_p7, %p3695_p6 }
  0xad   :  { %p3698_p9 = pnand %p3697_p8, %p3691_p5 }
  0xaf   :  { %3701 = shalt.err (!%p3698_p9)
}
  0xb0   :  { %149 = dma.hbm_to_vmem [thread:$0]  %s4278_s13, 2048, %s144_s19, [#allocation20], %s4292_s0, %s4292_s0, %s4291_s2  }
  0xb1   :  { %s3702_s4 = scalar_lea.hbm %s4280_s15, 1024 }
  0xb2   :  { %p3703_p10 = scmp.ne.s32.totalorder %s4280_s15, %s3702_s4  ;;  %p3706_p11 = scmp.lt.u32.totalorder %s3702_s4, %s4280_s15 }
  0xb4   :  { %p3708_p12 = pnand %p3706_p11, %p3703_p10 }
  0xb6   :  { %3711 = shalt.err (!%p3708_p12)
}
  0xb7   :  { %s3712_s26 = scalar_lea.vmem %s168_s20, 1024  ;;  %p3717_p0 = scmp.lt.s32.totalorder %s168_s20, %s168_s20 }
  0xb8   :  { %p3713_p13 = scmp.ne.s32.totalorder %s168_s20, %s3712_s26  ;;  %p3718_p1 = scmp.lt.s32.totalorder %s3712_s26, %s3712_s26 }
  0xba   :  { %p3719_p2 = por %p3718_p1, %p3717_p0 }
  0xbc   :  { %p3720_p3 = pnand %p3719_p2, %p3713_p13 }
  0xbe   :  { %3723 = shalt.err (!%p3720_p3)
}
  0xbf   :  { %173 = dma.hbm_to_vmem [thread:$0]  %s4280_s15, 1024, %s168_s20, [#allocation23], %s4292_s0, %s4292_s0, %s4291_s2  }
  0xc0   :  { %3768 = dma.done.wait [#allocation8], 128  }
  0xc1   :  { %3769 = vsyncadd [#allocation8], 4294967168 }
  0xc2   :  { %3770 = dma.done.wait [#allocation11], 512  }
  0xc3   :  { %3771 = vsyncadd [#allocation11], 4294966784 }
  0xc4   :  { %3772 = dma.done.wait [#allocation14], 4096  }
  0xc5   :  { %3773 = vsyncadd [#allocation14], 4294963200 }
  0xc6   :  { %3774 = dma.done.wait [#allocation17], 4096  }
  0xc7   :  { %3775 = vsyncadd [#allocation17], 4294963200 }
  0xc8   :  { %3776 = dma.done.wait [#allocation20], 4096  }
  0xc9   :  { %3777 = vsyncadd [#allocation20], 4294963200 }
  0xca   :  { %3778 = dma.done.wait [#allocation23], 9216  }
  0xcb   :  { %3779 = vsyncadd [#allocation23], 4294958080  ;;  %v3803_v0 = vmov 0.0   ;;  %vm3804_vm0 = vmmov 0   ;;  %v3220_v1 = vld [vmem:[#allocation7] sm:$0xff]   ;;  %v3221_v2 = vld [vmem:[#allocation10] sm:$0xff]   ;;  %v373_v48 = vlaneseq }
  0xcc   :  { %3082 = vmatprep.subr.bf16.mxu0 %v3803_v0  ;;  %3088 = vmatprep.subr.bf16.mxu1 %v3803_v0  ;;  %s4293_s19 = sld [smem:[#allocation36_spill]]  ;;  %vm231_vm1 = vcmask 130048   ;;  %s4294_s21 = sld [smem:[#allocation37_spill]]  ;;  %v3222_v7 = vld [vmem:[#allocation13] ss:$12 sps:$4 sm:$0xff]   ;;  %v3805_v29 = vmov 0  }
  0xcd   :  { %3084 = vmatprep.mubr.msk.bf16.mxu0 %vm3804_vm0, %v3803_v0  ;;  %3090 = vmatprep.mubr.msk.bf16.mxu1 %vm3804_vm0, %v3803_v0  ;;  %v3224_v8 = vld [vmem:[#allocation13 + $0x4] ss:$12 sps:$4 sm:$0xff]   ;;  %v3225_v9 = vld [vmem:[#allocation13 + $0x8] ss:$12 sps:$4 sm:$0xff]   ;;  %v3229_v12 = vld [vmem:[#allocation13 + $0x20] ss:$12 sps:$4 sm:$0xff]  }
  0xce   :  { %3083 = vmatpush3.bf16.msra.mxu0 %v3220_v1  ;;  %3089 = vmatpush3.bf16.msra.mxu1 %v3221_v2  ;;  %v3226_v10 = vld [vmem:[#allocation13 + $0x18] ss:$12 sps:$4 sm:$0xff]   ;;  %v3228_v11 = vld [vmem:[#allocation13 + $0x1c] ss:$12 sps:$4 sm:$0xff]   ;;  %v3232_v13 = vld [vmem:[#allocation13 + $0x34] ss:$12 sps:$4 sm:$0xff]  }
  0xcf   :  { %3094 = vmatprep.subr.bf16.mxu1 %v3803_v0  ;;  %516 = vmatprep.subr.bf16.mxu0 %v3224_v8  ;;  %v3230_v14 = vld [vmem:[#allocation13 + $0x30] ss:$12 sps:$4 sm:$0xff]   ;;  %v3233_v15 = vld [vmem:[#allocation13 + $0x38] ss:$12 sps:$4 sm:$0xff]   ;;  %v3234_v17 = vld [vmem:[#allocation13 + $0x48] ss:$12 sps:$4 sm:$0xff]  }
  0xd0   :  { %v3236_v16 = vld [vmem:[#allocation13 + $0x4c] ss:$12 sps:$4 sm:$0xff]   ;;  %v3237_v18 = vld [vmem:[#allocation13 + $0x50] ss:$12 sps:$4 sm:$0xff]   ;;  %v3241_v21 = vld [vmem:[#allocation13 + $0x68] ss:$12 sps:$4 sm:$0xff]  }
  0xd1   :  { %v3240_v19 = vld [vmem:[#allocation13 + $0x64] ss:$12 sps:$4 sm:$0xff]   ;;  %v3238_v20 = vld [vmem:[#allocation13 + $0x60] ss:$12 sps:$4 sm:$0xff]   ;;  %v3244_v22 = vld [vmem:[#allocation13 + $0x7c] ss:$12 sps:$4 sm:$0xff]  }
  0xd2   :  { %v216_v3 = vld [vmem:[%s4293_s19] sm:$0xf]  ;;  %v3242_v23 = vld [vmem:[#allocation13 + $0x78] ss:$12 sps:$4 sm:$0xff]   ;;  %v3245_v24 = vld [vmem:[#allocation13 + $0x80] ss:$12 sps:$4 sm:$0xff]  }
  0xd3   :  { %v275_v4 = vld [vmem:[%s4294_s21] sm:$0xf]  ;;  %v219_v5 = vpack.c.bf16 %v216_v3, %v216_v3  ;;  %v3248_v25 = vld [vmem:[#allocation13 + $0x94] ss:$12 sps:$4 sm:$0xff]   ;;  %v3246_v26 = vld [vmem:[#allocation13 + $0x90] ss:$12 sps:$4 sm:$0xff]  }
  0xd4   :  { %v278_v6 = vpack.c.bf16 %v275_v4, %v275_v4  ;;  %v3249_v27 = vld [vmem:[#allocation13 + $0x98] ss:$12 sps:$4 sm:$0xff]   ;;  %v3250_v30 = vld [vmem:[#allocation13 + $0xa8] ss:$12 sps:$4 sm:$0xff]   ;;  %v3253_v31 = vld [vmem:[#allocation13 + $0xb0] ss:$12 sps:$4 sm:$0xff]  }
  0xd5   :  { %3085 = vmatmul.mubr.msk.bf16.vlgmr.msra.gmra.mrb[0].mxu0 %vm231_vm1, %v219_v5  ;;  %v3252_v28 = vld [vmem:[#allocation13 + $0xac] ss:$12 sps:$4 sm:$0xff]   ;;  %v2793_v32 = vld [vmem:[#allocation12 + $0x8] ss:$0 sm:$0xff]  ;;  %v2796_v33 = vld [vmem:[#allocation12 + $0x9] ss:$0 sm:$0xff] }
  0xd6   :  { %3091 = vmatmul.mubr.msk.bf16.vlgmr.msra.gmra.mrb[0].mxu1 %vm231_vm1, %v278_v6  ;;  %517 = vmatpush1.bf16.msra.mxu0 %v3222_v7  ;;  %v336_v44 = vld [vmem:[#allocation12] sm:$0xff]  ;;  %v4111_v49 = vshrl.u32 %v373_v48, 7  ;;  %vm597_vm2 = vcmask 261120   ;;  %s3806_s6 = smov 96   ;;  %s3807_s30 = smov 32   ;;  %vm675_vm3 = vcmask 64512  }
  0xd7   :  { %3095 = vmatpush3.bf16.msra.mxu1 %v3225_v9  ;;  %3110 = vmatprep.mubr.msk.bf16.mxu1 %vm3804_vm0, %v3803_v0  ;;  %v371_v51 = vld [vmem:[%s4272_s7] ss:$8 sm:$0x7]  ;;  %vm932_vm4 = vcmask 523520   ;;  %vm1104_vm5 = vcmask 785920   ;;  %vm1276_vm6 = vcmask 1048320  }
  0xd8   :  { %518 = vmatprep.subr.bf16.mxu0 %v3228_v11  ;;  %3096 = vmatprep.subr.bf16.mxu1 %v3803_v0  ;;  %v383_v50 = vsub.s32 2, %v4111_v49  ;;  %v4118_v52 = vsub.s32 1, %v4111_v49  ;;  %v4123_v54 = vsub.s32 0, %v4111_v49  ;;  %s4295_s23 = sld [smem:[#allocation38_spill]]  ;;  %s3809_s13 = smov [#allocation26]  }
  0xd9   :  { %548 = vmatprep.mubr.bf16.mxu0 %v3805_v29  ;;  %s2773_s12 = sshll.u32 %s3809_s13, 4  ;;  %s2774_s12 = int_to_ptr.vmem [resolvable:$true] %s2773_s12 }
  0xda   :  { %519 = vmatpush1.bf16.msra.mxu0 %v3226_v10  ;;  %v384_v53 = vrot.slane %v371_v51, %v383_v50  ;;  %v380_v55 = vrot.slane %v371_v51, %v4118_v52  ;;  %v376_v61 = vrot.slane %v371_v51, %v4123_v54 }
  0xdb   :  { %3097 = vmatpush3.bf16.msra.mxu1 %v3229_v12  ;;  %520 = vmatprep.subr.bf16.mxu0 %v3232_v13 }
  0xdc   :  { %3098 = vmatprep.subr.bf16.mxu1 %v3803_v0 }
  0xde   :  { %521 = vmatpush1.bf16.msra.mxu0 %v3230_v14 }
  0xdf   :  { %3099 = vmatpush3.bf16.msra.mxu1 %v3233_v15  ;;  %522 = vmatprep.subr.bf16.mxu0 %v3236_v16 }
  0xe0   :  { %3100 = vmatprep.subr.bf16.mxu1 %v3803_v0 }
  0xe2   :  { %523 = vmatpush1.bf16.msra.mxu0 %v3234_v17 }
  0xe3   :  { %3101 = vmatpush3.bf16.msra.mxu1 %v3237_v18  ;;  %524 = vmatprep.subr.bf16.mxu0 %v3240_v19 }
  0xe4   :  { %3102 = vmatprep.subr.bf16.mxu1 %v3803_v0 }
  0xe6   :  { %525 = vmatpush1.bf16.msra.mxu0 %v3238_v20 }
  0xe7   :  { %3103 = vmatpush3.bf16.msra.mxu1 %v3241_v21  ;;  %526 = vmatprep.subr.bf16.mxu0 %v3244_v22 }
  0xe8   :  { %3104 = vmatprep.subr.bf16.mxu1 %v3803_v0 }
  0xea   :  { %527 = vmatpush1.bf16.msra.mxu0 %v3242_v23 }
  0xeb   :  { %3105 = vmatpush3.bf16.msra.mxu1 %v3245_v24  ;;  %528 = vmatprep.subr.bf16.mxu0 %v3248_v25 }
  0xec   :  { %3106 = vmatprep.subr.bf16.mxu1 %v3803_v0 }
  0xee   :  { %529 = vmatpush1.bf16.msra.mxu0 %v3246_v26 }
  0xef   :  { %3107 = vmatpush3.bf16.msra.mxu1 %v3249_v27  ;;  %530 = vmatprep.subr.bf16.mxu0 %v3252_v28 }
  0xf0   :  { %3108 = vmatprep.subr.bf16.mxu1 %v3803_v0 }
  0xf2   :  { %531 = vmatpush1.bf16.msra.mxu0 %v3250_v30 }
  0xf3   :  { %3109 = vmatpush3.bf16.msra.mxu1 %v3253_v31  ;;  %3114 = vmatprep.subr.mxu0 %v3803_v0 }
  0xf4   :  { %3119 = vmatprep.subr.mxu1 %v3803_v0 }
 0x1a8   :  { %v269_v34 = vpop.f32.mrb[0].mxu0 }
 0x1a9   :  { %v270_v35 = vadd.f32 %v2793_v32, %v269_v34  ;;  %v327_v36 = vpop.f32.mrb[0].mxu1  ;;  %v3086_v37 = vpop.f32.mrb[1].mxu0 }
 0x1aa   :  { %v328_v38 = vadd.f32 %v2796_v33, %v327_v36  ;;  %v3092_v39 = vpop.f32.mrb[1].mxu1  ;;  %v272_v40 = vpop.f32.mrb[2].mxu0 }
 0x1ab   :  { %333 = vst [vmem:[#allocation2] sm:$0xf] %v270_v35  ;;  %v330_v41 = vpop.f32.mrb[2].mxu1  ;;  %v3087_v42 = vpop.f32.mrb[3].mxu0 }
 0x1ac   :  { %334 = vst [vmem:[#allocation2 + $0x4] sm:$0xf] %v328_v38  ;;  %v3093_v43 = vpop.f32.mrb[3].mxu1 }
 0x1b3   :  { %v335_v45 = vld [vmem:[#allocation2] sm:$0xff] }
 0x1b4   :  { %v4103_v46 = vadd.f32 %v336_v44, %v335_v45 }
 0x1b6   :  { %v370_v47 = vpack.c.bf16 %v4103_v46, %v4103_v46 }
 0x1b8   :  { %549 = vmatmul.mubr.bf16.vlgmr.msra.gmra.mrb[4].mxu0 %v370_v47  ;;  %3111 = vmatmul.mubr.bf16.vlgmr.msra.gmra.mrb[4].mxu1 %v370_v47 }
 0x1b9   :  { %3116 = vmatprep.mubr.msk.f32.mxu0 %vm3804_vm0, %v3803_v0  ;;  %3121 = vmatprep.mubr.msk.f32.mxu1 %vm3804_vm0, %v3803_v0 }
 0x28b   :  { %v550_v56 = vpop.f32.mrb[4].mxu0  ;;  %v591_v57 = vpop.f32.mrb[4].mxu1 }
 0x28c   :  { %v4126_v58 = vadd.f32 %v591_v57, %v384_v53  ;;  %v552_v59 = vpop.f32.mrb[5].mxu0  ;;  %v3112_v60 = vpop.f32.mrb[5].mxu1  ;;  %v551_v4 = vadd.f32 %v550_v56, %v376_v61 }
 0x28d   :  { %v553_v62 = vadd.f32 %v552_v59, %v380_v55  ;;  %v554_v63 = vpop.f32.mrb[6].mxu0  ;;  %v594_v1 = vpop.f32.mrb[6].mxu1 }
 0x28e   :  { %v555_v2 = vpop.f32.mrb[7].mxu0  ;;  %v3113_v3 = vpop.f32.mrb[7].mxu1  ;;  %3120 = vmatpush3.msra.mxu1 %v4126_v58 }
 0x28f   :  { %936 = vrot.lane.b32.xlu1 %v553_v62, %s4292_s0  ;;  %763 = vrot.lane.b32.xlu0 %v553_v62, %s3806_s6 }
 0x290   :  { %3115 = vmatpush3.xpose.msk.msra.mxu0 %vm597_vm2, %v553_v62  ;;  %3129 = vmatprep.subr.mxu1 %v3803_v0 }
 0x291   :  { %3124 = vmatprep.subr.mxu0 %v3803_v0 }
 0x293   :  { %3117 = vmatmul.mubr.msk.f32.vlgmr.msra.gmra.mrb[8].mxu0 %vm597_vm2, %v551_v4  ;;  %934 = vrot.lane.b32.xlu1 %v551_v4, %s4292_s0 }
 0x294   :  { %761 = vrot.lane.b32.xlu0 %v551_v4, %s3806_s6  ;;  %3126 = vmatprep.mubr.msk.f32.mxu0 %vm3804_vm0, %v3803_v0 }
 0x297   :  { %1106 = vrot.lane.b32.xlu1 %v551_v4, %s3807_s30 }
 0x298   :  { %1108 = vrot.lane.b32.xlu0 %v553_v62, %s3807_s30 }
 0x301   :  { %v764_v5 = vpop.permute.xlu0 %763  ;;  %v937_v6 = vpop.permute.xlu1 %936 }
 0x302   :  { %3125 = vmatpush3.xpose.msk.msra.mxu0 %vm597_vm2, %v764_v5  ;;  %v3254_v5 = vld [vmem:[#allocation15] sm:$0xff]  }
 0x303   :  { %3134 = vmatprep.subr.mxu0 %v3803_v0 }
 0x305   :  { %v935_v8 = vpop.permute.xlu1 %934 }
 0x306   :  { %v762_v7 = vpop.permute.xlu0 %761 }
 0x307   :  { %3127 = vmatmul.mubr.msk.f32.vlgmr.msra.gmra.mrb[10].mxu0 %vm597_vm2, %v762_v7  ;;  %v3256_v7 = vld [vmem:[#allocation15 + $0x10] sm:$0xff]  }
 0x308   :  { %3135 = vmatpush3.xpose.msk.msra.mxu0 %vm597_vm2, %v937_v6  ;;  %3136 = vmatprep.mubr.msk.f32.mxu0 %vm3804_vm0, %v3803_v0  ;;  %v3255_v6 = vld [vmem:[#allocation15 + $0x8] sm:$0xff]  }
 0x309   :  { %3144 = vmatprep.subr.mxu0 %v3803_v0  ;;  %v1107_v10 = vpop.permute.xlu1 %1106 }
 0x30a   :  { %v1109_v9 = vpop.permute.xlu0 %1108 }
 0x30b   :  { %3137 = vmatmul.mubr.msk.f32.vlgmr.msra.gmra.mrb[12].mxu0 %vm597_vm2, %v935_v8  ;;  %v3257_v8 = vld [vmem:[#allocation15 + $0x18] sm:$0xff]  }
 0x30c   :  { %3145 = vmatpush3.xpose.msk.msra.mxu0 %vm597_vm2, %v1109_v9  ;;  %3146 = vmatprep.mubr.msk.f32.mxu0 %vm3804_vm0, %v3803_v0 }
 0x30d   :  { %3154 = vmatprep.subr.bf16.mxu0 %v3803_v0 }
 0x30f   :  { %3147 = vmatmul.mubr.msk.f32.vlgmr.msra.gmra.mrb[14].mxu0 %vm597_vm2, %v1107_v10 }
 0x310   :  { %3170 = vmatprep.mubr.msk.bf16.mxu0 %vm3804_vm0, %v3803_v0  ;;  %3155 = vmatpush3.bf16.msra.mxu0 %v3254_v5  ;;  %v3296_v5 = vld [vmem:[#allocation18 + $0x68] sm:$0xff]  }
 0x311   :  { %3156 = vmatprep.subr.bf16.mxu0 %v3803_v0 }
 0x314   :  { %3157 = vmatpush3.bf16.msra.mxu0 %v3255_v6  ;;  %v3297_v6 = vld [vmem:[#allocation18 + $0x28] sm:$0xff]  }
 0x315   :  { %3158 = vmatprep.subr.bf16.mxu0 %v3803_v0 }
 0x318   :  { %3159 = vmatpush3.bf16.msra.mxu0 %v3256_v7 }
 0x319   :  { %3160 = vmatprep.subr.bf16.mxu0 %v3803_v0 }
 0x31c   :  { %3161 = vmatpush3.bf16.msra.mxu0 %v3257_v8 }
 0x31d   :  { %3162 = vmatprep.subr.bf16.mxu0 %v3803_v0 }
 0x366   :  { %v670_v11 = vpop.f32.mrb[8].mxu0 }
 0x367   :  { %v674_v12 = vmul.f32 0.17677669, %v670_v11  ;;  %v3118_v13 = vpop.f32.mrb[9].mxu0  ;;  %v3258_v11 = vld [vmem:[#allocation15 + $0x20] sm:$0xff]  }
 0x368   :  { %3163 = vmatpush3.bf16.msra.mxu0 %v3258_v11  ;;  %v3260_v13 = vld [vmem:[#allocation15 + $0x30] sm:$0xff]  }
 0x369   :  { %v676_v14 = vsel %vm675_vm3, %v674_v12, -inf  ;;  %3164 = vmatprep.subr.bf16.mxu0 %v3803_v0  ;;  %v2844_v11 = vld [vmem:[#allocation12 + $0xb] ss:$0 sm:$0xff] }
 0x36a   :  { %677 = vmax.xlane.f32.xlu0 %v676_v14  ;;  %v3261_v14 = vld [vmem:[#allocation15 + $0x38] sm:$0xff]  }
 0x3da   :  { %v835_v15 = vpop.f32.mrb[10].mxu0 }
 0x3db   :  { %v839_v16 = vmul.f32 0.17677669, %v835_v15  ;;  %v3128_v17 = vpop.f32.mrb[11].mxu0 }
 0x3dd   :  { %v840_v18 = vsel %vm675_vm3, %v839_v16, -inf }
 0x3de   :  { %841 = vmax.xlane.f32.xlu1 %v840_v18  ;;  %v1008_v19 = vpop.f32.mrb[12].mxu0 }
 0x3df   :  { %v1012_v20 = vmul.f32 0.17677669, %v1008_v19  ;;  %v3138_v21 = vpop.f32.mrb[13].mxu0 }
 0x3e1   :  { %v1013_v22 = vsel %vm675_vm3, %v1012_v20, -inf }
 0x3e2   :  { %1014 = vmax.xlane.f32.xlu0 %v1013_v22  ;;  %v1180_v23 = vpop.f32.mrb[14].mxu0 }
 0x3e3   :  { %v1184_v24 = vmul.f32 0.17677669, %v1180_v23  ;;  %v3148_v25 = vpop.f32.mrb[15].mxu0 }
 0x3e5   :  { %v1185_v26 = vsel %vm675_vm3, %v1184_v24, -inf }
 0x3e6   :  { %1186 = vmax.xlane.f32.xlu0 %v1185_v26  ;;  %v2835_v26 = vld [vmem:[#allocation12 + $0xa] ss:$0 sm:$0xff] }
 0x3ef   :  { %852 = vrot.lane.b32.xlu1 %v4126_v58, %s3806_s6 }
 0x3f7   :  { %v678_v27 = vpop.xlane.xlu0 %677 }
 0x3f8   :  { %v679_v28 = vsub.f32 %v674_v12, %v678_v27  ;;  %v3259_v12 = vld [vmem:[#allocation15 + $0x28] sm:$0xff]  }
 0x3f9   :  { %3165 = vmatpush3.bf16.msra.mxu0 %v3259_v12 }
 0x3fa   :  { %v680_v30 = vmul.f32 1.442695, %v679_v28  ;;  %3166 = vmatprep.subr.bf16.mxu0 %v3803_v0 }
 0x3fc   :  { %3446 = vpow2.f32 %v680_v30 }
 0x3fd   :  { %3167 = vmatpush3.bf16.msra.mxu0 %v3260_v13  ;;  %v2845_v13 = vld [vmem:[#allocation12 + $0xc] ss:$0 sm:$0xff] }
 0x3fe   :  { %3168 = vmatprep.subr.bf16.mxu0 %v3803_v0 }
 0x401   :  { %3169 = vmatpush3.bf16.msra.mxu0 %v3261_v14 }
 0x406   :  { %v3447_v31 = vpop.eup %3446 }
 0x407   :  { %v682_v32 = vsel %vm675_vm3, %v3447_v31, 0.0 }
 0x413   :  { %683 = vadd.xlane.f32.xlu1 %v682_v32 }
 0x46b   :  { %v842_v33 = vpop.xlane.xlu1 %841 }
 0x46c   :  { %v843_v34 = vsub.f32 %v839_v16, %v842_v33 }
 0x46e   :  { %v844_v35 = vmul.f32 1.442695, %v843_v34  ;;  %v3262_v34 = vld [vmem:[#allocation16] ss:$8 sps:$4 sm:$0xff]  }
 0x46f   :  { %v1015_v36 = vpop.xlane.xlu0 %1014  ;;  %v853_v51 = vpop.permute.xlu1 %852 }
 0x470   :  { %3448 = vpow2.f32 %v844_v35  ;;  %v1016_v37 = vsub.f32 %v1012_v20, %v1015_v36  ;;  %v3264_v35 = vld [vmem:[#allocation16 + $0x4] ss:$8 sps:$4 sm:$0xff]   ;;  %v3267_v36 = vld [vmem:[#allocation16 + $0x14] ss:$8 sps:$4 sm:$0xff]  }
 0x472   :  { %v1017_v38 = vmul.f32 1.442695, %v1016_v37  ;;  %v3265_v37 = vld [vmem:[#allocation16 + $0x10] ss:$8 sps:$4 sm:$0xff]  }
 0x473   :  { %v1187_v39 = vpop.xlane.xlu0 %1186 }
 0x474   :  { %3450 = vpow2.f32 %v1017_v38  ;;  %v1188_v40 = vsub.f32 %v1184_v24, %v1187_v39  ;;  %v3270_v38 = vld [vmem:[#allocation16 + $0x24] ss:$8 sps:$4 sm:$0xff]   ;;  %v3268_v39 = vld [vmem:[#allocation16 + $0x20] ss:$8 sps:$4 sm:$0xff]  }
 0x476   :  { %v1189_v41 = vmul.f32 1.442695, %v1188_v40 }
 0x478   :  { %3452 = vpow2.f32 %v1189_v41 }
 0x47a   :  { %v3449_v42 = vpop.eup %3448 }
 0x47b   :  { %v846_v43 = vsel %vm675_vm3, %v3449_v42, 0.0 }
 0x47c   :  { %847 = vadd.xlane.f32.xlu0 %v846_v43 }
 0x47e   :  { %v3451_v44 = vpop.eup %3450 }
 0x47f   :  { %v1019_v45 = vsel %vm675_vm3, %v3451_v44, 0.0 }
 0x480   :  { %1020 = vadd.xlane.f32.xlu1 %v1019_v45  ;;  %v3276_v45 = vld [vmem:[#allocation16 + $0x44] ss:$8 sps:$4 sm:$0xff]  }
 0x482   :  { %v3453_v47 = vpop.eup %3452 }
 0x483   :  { %v1191_v48 = vsel %vm675_vm3, %v3453_v47, 0.0 }
 0x484   :  { %1192 = vadd.xlane.f32.xlu0 %v1191_v48  ;;  %v3279_v48 = vld [vmem:[#allocation16 + $0x54] ss:$8 sps:$4 sm:$0xff]  }
 0x491   :  { %1196 = vrot.lane.b32.xlu1 %v4126_v58, %s3807_s30 }
 0x49a   :  { %1024 = vrot.lane.b32.xlu0 %v4126_v58, %s4292_s0 }
 0x4a0   :  { %v684_v53 = vpop.xlane.xlu1 %683 }
 0x4a1   :  { %3454 = vrcp.f32 %v684_v53  ;;  %v3282_v53 = vld [vmem:[#allocation16 + $0x64] ss:$8 sps:$4 sm:$0xff]  }
 0x4ab   :  { %v3455_v55 = vpop.eup %3454 }
 0x4ac   :  { %v686_v56 = vmul.f32 %v3455_v55, %v3447_v31  ;;  %v3280_v55 = vld [vmem:[#allocation16 + $0x60] ss:$8 sps:$4 sm:$0xff]  }
 0x4ae   :  { %3122 = vmatmul.mubr.msk.f32.vlgmr.msra.gmra.mrb[8].mxu1 %vm675_vm3, %v686_v56  ;;  %v3285_v56 = vld [vmem:[#allocation16 + $0x74] ss:$8 sps:$4 sm:$0xff]  }
 0x4af   :  { %3130 = vmatpush3.msra.mxu1 %v853_v51  ;;  %3131 = vmatprep.mubr.msk.f32.mxu1 %vm3804_vm0, %v3803_v0  ;;  %v3277_v51 = vld [vmem:[#allocation16 + $0x50] ss:$8 sps:$4 sm:$0xff]  }
 0x4b0   :  { %3139 = vmatprep.subr.mxu1 %v3803_v0 }
 0x509   :  { %v848_v57 = vpop.xlane.xlu0 %847 }
 0x50a   :  { %3456 = vrcp.f32 %v848_v57  ;;  %v3283_v57 = vld [vmem:[#allocation16 + $0x70] ss:$8 sps:$4 sm:$0xff]  }
 0x50d   :  { %v1021_v59 = vpop.xlane.xlu1 %1020 }
 0x50e   :  { %3458 = vrcp.f32 %v1021_v59  ;;  %v3286_v59 = vld [vmem:[#allocation18 + $0x40] sm:$0xff]  }
 0x50f   :  { %3029 = vmatprep.subr.bf16.mxu0 %v3286_v59  ;;  %v3316_v59 = vld [vmem:[#allocation19 + $0x44] ss:$8 sps:$4 sm:$0xff]  }
 0x511   :  { %v1193_v60 = vpop.xlane.xlu0 %1192  ;;  %v1197_v2 = vpop.permute.xlu1 %1196 }
 0x512   :  { %3460 = vrcp.f32 %v1193_v60  ;;  %v3287_v60 = vld [vmem:[#allocation18] sm:$0xff]  }
 0x514   :  { %v3457_v58 = vpop.eup %3456 }
 0x515   :  { %v850_v61 = vmul.f32 %v3457_v58, %v3449_v42  ;;  %v1025_v62 = vpop.permute.xlu0 %1024  ;;  %v3288_v58 = vld [vmem:[#allocation18 + $0x48] sm:$0xff]  }
 0x517   :  { %3132 = vmatmul.mubr.msk.f32.vlgmr.msra.gmra.mrb[10].mxu1 %vm675_vm3, %v850_v61  ;;  %v3289_v61 = vld [vmem:[#allocation18 + $0x8] sm:$0xff]  }
 0x518   :  { %v3459_v63 = vpop.eup %3458  ;;  %3140 = vmatpush3.msra.mxu1 %v1025_v62  ;;  %3141 = vmatprep.mubr.msk.f32.mxu1 %vm3804_vm0, %v3803_v0  ;;  %v3290_v62 = vld [vmem:[#allocation18 + $0x50] sm:$0xff]  }
 0x519   :  { %v1023_v1 = vmul.f32 %v3459_v63, %v3451_v44  ;;  %3149 = vmatprep.subr.mxu1 %v3803_v0  ;;  %v3273_v44 = vld [vmem:[#allocation16 + $0x34] ss:$8 sps:$4 sm:$0xff]  }
 0x51a   :  { %v3291_v63 = vld [vmem:[#allocation18 + $0x10] sm:$0xff]  }
 0x51b   :  { %3142 = vmatmul.mubr.msk.f32.vlgmr.msra.gmra.mrb[12].mxu1 %vm675_vm3, %v1023_v1  ;;  %v3292_v1 = vld [vmem:[#allocation18 + $0x58] sm:$0xff]  }
 0x51c   :  { %v3461_v3 = vpop.eup %3460  ;;  %3150 = vmatpush3.msra.mxu1 %v1197_v2  ;;  %3151 = vmatprep.mubr.msk.f32.mxu1 %vm3804_vm0, %v3803_v0  ;;  %v3293_v2 = vld [vmem:[#allocation18 + $0x18] sm:$0xff]  }
 0x51d   :  { %v1195_v4 = vmul.f32 %v3461_v3, %v3453_v47  ;;  %1524 = vmatprep.subr.bf16.mxu1 %v3264_v35  ;;  %v3274_v47 = vld [vmem:[#allocation16 + $0x40] ss:$8 sps:$4 sm:$0xff]   ;;  %v2863_v35 = vld [vmem:[#allocation12 + $0xd] ss:$0 sm:$0xff] }
 0x51e   :  { %v3294_v3 = vld [vmem:[#allocation18 + $0x60] sm:$0xff]  }
 0x51f   :  { %3152 = vmatmul.mubr.msk.f32.vlgmr.msra.gmra.mrb[14].mxu1 %vm675_vm3, %v1195_v4  ;;  %v3295_v4 = vld [vmem:[#allocation18 + $0x20] sm:$0xff]  }
 0x520   :  { %1556 = vmatprep.mubr.bf16.mxu1 %v3805_v29  ;;  %1525 = vmatpush1.bf16.msra.mxu1 %v3262_v34 }
 0x521   :  { %1526 = vmatprep.subr.bf16.mxu1 %v3267_v36 }
 0x524   :  { %1527 = vmatpush1.bf16.msra.mxu1 %v3265_v37 }
 0x525   :  { %1528 = vmatprep.subr.bf16.mxu1 %v3270_v38 }
 0x528   :  { %1529 = vmatpush1.bf16.msra.mxu1 %v3268_v39 }
 0x529   :  { %1530 = vmatprep.subr.bf16.mxu1 %v3273_v44  ;;  %v3307_v44 = vld [vmem:[#allocation19 + $0x14] ss:$8 sps:$4 sm:$0xff]  }
 0x581   :  { %v756_v9 = vpop.f32.mrb[8].mxu1 }
 0x582   :  { %760 = vst.msk [vmem:[#allocation3] sm:$0xff] %vm597_vm2, %v756_v9  ;;  %v3123_v10 = vpop.f32.mrb[9].mxu1 }
 0x5ea   :  { %v924_v15 = vpop.f32.mrb[10].mxu1 }
 0x5eb   :  { %929 = vrot.lane.b32.xlu1 %v924_v15, %s3807_s30  ;;  %v3133_v16 = vpop.f32.mrb[11].mxu1 }
 0x5ee   :  { %v1096_v17 = vpop.f32.mrb[12].mxu1 }
 0x5ef   :  { %1101 = vrot.lane.b32.xlu0 %v1096_v17, %s4292_s0  ;;  %v3143_v18 = vpop.f32.mrb[13].mxu1  ;;  %v3298_v17 = vld [vmem:[#allocation18 + $0x70] sm:$0xff]  }
 0x5f0   :  { %v3299_v18 = vld [vmem:[#allocation18 + $0x30] sm:$0xff]  }
 0x5f2   :  { %v1268_v19 = vpop.f32.mrb[14].mxu1 }
 0x5f3   :  { %1273 = vrot.lane.b32.xlu1 %v1268_v19, %s3806_s6  ;;  %v3153_v20 = vpop.f32.mrb[15].mxu1  ;;  %v3300_v19 = vld [vmem:[#allocation18 + $0x78] sm:$0xff]  }
 0x5f4   :  { %v3301_v20 = vld [vmem:[#allocation18 + $0x38] sm:$0xff]  }
 0x65d   :  { %v930_v21 = vpop.permute.xlu1 %929 }
 0x65e   :  { %933 = vst.msk [vmem:[#allocation3] sm:$0xff] %vm932_vm4, %v930_v21  ;;  %v2846_v21 = vld [vmem:[%s4272_s7 + $0x1] ss:$8 sm:$0x3] }
 0x661   :  { %v1102_v22 = vpop.permute.xlu0 %1101 }
 0x662   :  { %1105 = vst.msk [vmem:[#allocation3] sm:$0xff] %vm1104_vm5, %v1102_v22  ;;  %v1437_v22 = vrot.slane %v2846_v21, %v4123_v54 }
 0x665   :  { %v1274_v23 = vpop.permute.xlu1 %1273 }
 0x666   :  { %1277 = vst.msk [vmem:[#allocation3] sm:$0xff] %vm1276_vm6, %v1274_v23  ;;  %v1441_v23 = vrot.slane %v2846_v21, %v4118_v52  ;;  %v2881_v21 = vld [vmem:[#allocation12 + $0xf] ss:$0 sm:$0xff] }
 0x66d   :  { %v1278_v24 = vld [vmem:[#allocation3] sm:$0xff] }
 0x66e   :  { %v1295_v25 = vpack.c.bf16 %v1278_v24, %v1278_v24 }
 0x670   :  { %3171 = vmatmul.mubr.bf16.vlgmr.msra.gmra.mrb[16].mxu0 %v1295_v25 }
 0x671   :  { %3030 = vmatpush3.bf16.msra.mxu0 %v3287_v60  ;;  %v3314_v60 = vld [vmem:[#allocation19 + $0x40] ss:$8 sps:$4 sm:$0xff]  }
 0x672   :  { %3031 = vmatprep.subr.bf16.mxu0 %v3288_v58  ;;  %v3319_v58 = vld [vmem:[#allocation19 + $0x54] ss:$8 sps:$4 sm:$0xff]  }
 0x675   :  { %3032 = vmatpush3.bf16.msra.mxu0 %v3289_v61  ;;  %v3317_v61 = vld [vmem:[#allocation19 + $0x50] ss:$8 sps:$4 sm:$0xff]  }
 0x676   :  { %3033 = vmatprep.subr.bf16.mxu0 %v3290_v62  ;;  %v3322_v62 = vld [vmem:[#allocation19 + $0x64] ss:$8 sps:$4 sm:$0xff]  }
 0x679   :  { %3034 = vmatpush3.bf16.msra.mxu0 %v3291_v63  ;;  %v3320_v63 = vld [vmem:[#allocation19 + $0x60] ss:$8 sps:$4 sm:$0xff]  }
 0x67a   :  { %3035 = vmatprep.subr.bf16.mxu0 %v3292_v1  ;;  %v3325_v1 = vld [vmem:[#allocation19 + $0x74] ss:$8 sps:$4 sm:$0xff]  }
 0x67d   :  { %3036 = vmatpush3.bf16.msra.mxu0 %v3293_v2  ;;  %v3323_v2 = vld [vmem:[#allocation19 + $0x70] ss:$8 sps:$4 sm:$0xff]  }
 0x67e   :  { %3037 = vmatprep.subr.bf16.mxu0 %v3294_v3  ;;  %v3326_v3 = vld [vmem:[#allocation21 + $0x40] sm:$0xff]  }
 0x681   :  { %3038 = vmatpush3.bf16.msra.mxu0 %v3295_v4  ;;  %v3327_v4 = vld [vmem:[#allocation21] sm:$0xff]  }
 0x682   :  { %3039 = vmatprep.subr.bf16.mxu0 %v3296_v5  ;;  %v3328_v5 = vld [vmem:[#allocation21 + $0x48] sm:$0xff]  }
 0x685   :  { %3040 = vmatpush3.bf16.msra.mxu0 %v3297_v6  ;;  %v3329_v6 = vld [vmem:[#allocation21 + $0x8] sm:$0xff]  }
 0x686   :  { %3041 = vmatprep.subr.bf16.mxu0 %v3298_v17 }
 0x689   :  { %3042 = vmatpush3.bf16.msra.mxu0 %v3299_v18 }
 0x68a   :  { %3043 = vmatprep.subr.bf16.mxu0 %v3300_v19  ;;  %v2880_v19 = vld [vmem:[#allocation12 + $0xe] ss:$0 sm:$0xff] }
 0x68d   :  { %3044 = vmatpush3.bf16.msra.mxu0 %v3301_v20 }
 0x68e   :  { %3051 = vmatprep.subr.bf16.mxu0 %v3326_v3  ;;  %v3362_v3 = vld [vmem:[#allocation22 + $0x64] ss:$16 sps:$4 sm:$0xff]  }
 0x743   :  { %v1383_v27 = vpop.f32.mrb[16].mxu0 }
 0x744   :  { %v1384_v28 = vadd.f32 %v2835_v26, %v1383_v27  ;;  %v3172_v30 = vpop.f32.mrb[17].mxu0 }
 0x745   :  { %v1386_v31 = vpop.f32.mrb[18].mxu0 }
 0x746   :  { %v3173_v32 = vpop.f32.mrb[19].mxu0  ;;  %v1389_v33 = vadd.f32 %v1384_v28, %v4103_v46  ;;  %v3271_v46 = vld [vmem:[#allocation16 + $0x30] ss:$8 sps:$4 sm:$0xff]  }
 0x747   :  { %1531 = vmatpush1.bf16.msra.mxu1 %v3271_v46  ;;  %v3305_v46 = vld [vmem:[#allocation19 + $0x10] ss:$8 sps:$4 sm:$0xff]  }
 0x748   :  { %1392 = vadd.xlane.f32.xlu0 %v1389_v33  ;;  %1532 = vmatprep.subr.bf16.mxu1 %v3276_v45  ;;  %v3310_v45 = vld [vmem:[#allocation19 + $0x24] ss:$8 sps:$4 sm:$0xff]  }
 0x74b   :  { %1533 = vmatpush1.bf16.msra.mxu1 %v3274_v47  ;;  %v3308_v47 = vld [vmem:[#allocation19 + $0x20] ss:$8 sps:$4 sm:$0xff]  }
 0x74c   :  { %1534 = vmatprep.subr.bf16.mxu1 %v3279_v48 }
 0x74f   :  { %1535 = vmatpush1.bf16.msra.mxu1 %v3277_v51 }
 0x750   :  { %1536 = vmatprep.subr.bf16.mxu1 %v3282_v53 }
 0x753   :  { %1537 = vmatpush1.bf16.msra.mxu1 %v3280_v55 }
 0x754   :  { %1538 = vmatprep.subr.bf16.mxu1 %v3285_v56  ;;  %v3313_v56 = vld [vmem:[#allocation19 + $0x34] ss:$8 sps:$4 sm:$0xff]  }
 0x757   :  { %1539 = vmatpush1.bf16.msra.mxu1 %v3283_v57  ;;  %v3311_v57 = vld [vmem:[#allocation19 + $0x30] ss:$8 sps:$4 sm:$0xff]  }
 0x7d5   :  { %v1393_v40 = vpop.xlane.xlu0 %1392 }
 0x7d6   :  { %v1395_v41 = vmul.f32 0.0078125, %v1393_v40 }
 0x7d8   :  { %v1396_v42 = vsub.f32 %v1389_v33, %v1395_v41 }
 0x7da   :  { %v1397_v43 = vmul.f32 %v1396_v42, %v1396_v42 }
 0x7dc   :  { %1398 = vadd.xlane.f32.xlu1 %v1397_v43  ;;  %v3304_v43 = vld [vmem:[#allocation19 + $0x4] ss:$8 sps:$4 sm:$0xff]  }
 0x7dd   :  { %1876 = vmatprep.subr.bf16.mxu1 %v3304_v43  ;;  %v2899_v43 = vld [vmem:[#allocation12 + $0x10] ss:$0 sm:$0xff] }
 0x869   :  { %v1399_v7 = vpop.xlane.xlu1 %1398 }
 0x86a   :  { %v1400_v8 = vmul.f32 0.0078125, %v1399_v7  ;;  %v3330_v7 = vld [vmem:[#allocation21 + $0x50] sm:$0xff]  }
 0x86c   :  { %v1401_v9 = vadd.f32 1e-05, %v1400_v8  ;;  %v3331_v8 = vld [vmem:[#allocation21 + $0x10] sm:$0xff]  }
 0x86e   :  { %3462 = vrsqrt.f32 %v1401_v9  ;;  %v3332_v9 = vld [vmem:[#allocation21 + $0x58] sm:$0xff]  }
 0x878   :  { %v3463_v10 = vpop.eup %3462 }
 0x879   :  { %v1403_v12 = vmul.f32 %v3463_v10, %v1396_v42  ;;  %v3302_v42 = vld [vmem:[#allocation19] ss:$8 sps:$4 sm:$0xff]   ;;  %v3333_v10 = vld [vmem:[#allocation21 + $0x18] sm:$0xff]  }
 0x87b   :  { %v1408_v14 = vmul.f32 %v2844_v11, %v1403_v12  ;;  %v3334_v11 = vld [vmem:[#allocation21 + $0x60] sm:$0xff]  }
 0x87c   :  { %v3335_v12 = vld [vmem:[#allocation21 + $0x20] sm:$0xff]  }
 0x87d   :  { %v1413_v15 = vadd.f32 %v2845_v13, %v1408_v14  ;;  %v3336_v13 = vld [vmem:[#allocation21 + $0x68] sm:$0xff]  }
 0x87e   :  { %v3337_v14 = vld [vmem:[#allocation21 + $0x28] sm:$0xff]  }
 0x87f   :  { %v1430_v16 = vpack.c.bf16 %v1413_v15, %v1413_v15 }
 0x881   :  { %1557 = vmatmul.mubr.bf16.vlgmr.msra.gmra.mrb[16].mxu1 %v1430_v16 }
 0x882   :  { %1908 = vmatprep.mubr.bf16.mxu1 %v3805_v29  ;;  %1877 = vmatpush1.bf16.msra.mxu1 %v3302_v42 }
 0x883   :  { %1878 = vmatprep.subr.bf16.mxu1 %v3307_v44 }
 0x886   :  { %1879 = vmatpush1.bf16.msra.mxu1 %v3305_v46 }
 0x887   :  { %1880 = vmatprep.subr.bf16.mxu1 %v3310_v45 }
 0x88a   :  { %1881 = vmatpush1.bf16.msra.mxu1 %v3308_v47 }
 0x88b   :  { %1882 = vmatprep.subr.bf16.mxu1 %v3313_v56  ;;  %v3345_v56 = vld [vmem:[#allocation22 + $0x8] ss:$16 sps:$4 sm:$0xff]  }
 0x88e   :  { %1883 = vmatpush1.bf16.msra.mxu1 %v3311_v57  ;;  %v3347_v57 = vld [vmem:[#allocation22 + $0xc] ss:$16 sps:$4 sm:$0xff]  }
 0x88f   :  { %1884 = vmatprep.subr.bf16.mxu1 %v3316_v59  ;;  %v3350_v59 = vld [vmem:[#allocation22 + $0x24] ss:$16 sps:$4 sm:$0xff]  }
 0x892   :  { %1885 = vmatpush1.bf16.msra.mxu1 %v3314_v60  ;;  %v3353_v60 = vld [vmem:[#allocation22 + $0x2c] ss:$16 sps:$4 sm:$0xff]  }
 0x893   :  { %1886 = vmatprep.subr.bf16.mxu1 %v3319_v58  ;;  %v3348_v58 = vld [vmem:[#allocation22 + $0x20] ss:$16 sps:$4 sm:$0xff]  }
 0x896   :  { %1887 = vmatpush1.bf16.msra.mxu1 %v3317_v61  ;;  %v3351_v61 = vld [vmem:[#allocation22 + $0x28] ss:$16 sps:$4 sm:$0xff]  }
 0x897   :  { %1888 = vmatprep.subr.bf16.mxu1 %v3322_v62  ;;  %v3356_v62 = vld [vmem:[#allocation22 + $0x44] ss:$16 sps:$4 sm:$0xff]  }
 0x89a   :  { %1889 = vmatpush1.bf16.msra.mxu1 %v3320_v63  ;;  %v3359_v63 = vld [vmem:[#allocation22 + $0x4c] ss:$16 sps:$4 sm:$0xff]  }
 0x89b   :  { %1890 = vmatprep.subr.bf16.mxu1 %v3325_v1  ;;  %v3354_v1 = vld [vmem:[#allocation22 + $0x40] ss:$16 sps:$4 sm:$0xff]  }
 0x89e   :  { %1891 = vmatpush1.bf16.msra.mxu1 %v3323_v2  ;;  %v3357_v2 = vld [vmem:[#allocation22 + $0x48] ss:$16 sps:$4 sm:$0xff]  }
 0x954   :  { %v1558_v24 = vpop.f32.mrb[16].mxu1 }
 0x955   :  { %v1559_v25 = vadd.f32 %v1558_v24, %v1437_v22  ;;  %v1560_v26 = vpop.f32.mrb[17].mxu1 }
 0x956   :  { %v1561_v29 = vadd.f32 %v1560_v26, %v1441_v23  ;;  %v1562_v27 = vpop.f32.mrb[18].mxu1  ;;  %v3339_v26 = vld [vmem:[#allocation21 + $0x30] sm:$0xff]  }
 0x957   :  { %v1565_v28 = vmax.f32 %v1559_v25, 0.0  ;;  %v1563_v30 = vpop.f32.mrb[19].mxu1  ;;  %v3338_v25 = vld [vmem:[#allocation21 + $0x70] sm:$0xff]   ;;  %v3341_v27 = vld [vmem:[#allocation21 + $0x38] sm:$0xff]  }
 0x958   :  { %v1566_v31 = vmax.f32 %v1561_v29, 0.0  ;;  %v3340_v29 = vld [vmem:[#allocation21 + $0x78] sm:$0xff]  }
 0x959   :  { %v1599_v33 = vpack.c.bf16 %v1565_v28, %v1565_v28  ;;  %v2882_v28 = vld [vmem:[%s4272_s7 + $0x2] ss:$8 sm:$0x3] }
 0x95a   :  { %v1600_v32 = vpack.c.bf16 %v1566_v31, %v1566_v31  ;;  %v1789_v30 = vrot.slane %v2882_v28, %v4123_v54  ;;  %v1793_v31 = vrot.slane %v2882_v28, %v4118_v52  ;;  %v3396_v28 = vld [vmem:[#allocation22 + $0x120] ss:$16 sps:$4 sm:$0xff]  }
 0x95c   :  { %1734 = vmatprep.mubr.bf16.mxu0 %v1600_v32 }
 0x95d   :  { %1735 = vmatmul.mubr.bf16.vlgmr.msra.gmra.mrb[20].mxu0 %v1599_v33 }
 0x95e   :  { %3052 = vmatpush3.bf16.msra.mxu0 %v3327_v4  ;;  %v3365_v4 = vld [vmem:[#allocation22 + $0x6c] ss:$16 sps:$4 sm:$0xff]  }
 0x95f   :  { %3053 = vmatprep.subr.bf16.mxu0 %v3328_v5  ;;  %v3360_v5 = vld [vmem:[#allocation22 + $0x60] ss:$16 sps:$4 sm:$0xff]  }
 0x962   :  { %3054 = vmatpush3.bf16.msra.mxu0 %v3329_v6  ;;  %v3363_v6 = vld [vmem:[#allocation22 + $0x68] ss:$16 sps:$4 sm:$0xff]  }
 0x963   :  { %3055 = vmatprep.subr.bf16.mxu0 %v3330_v7  ;;  %v3368_v7 = vld [vmem:[#allocation22 + $0x84] ss:$16 sps:$4 sm:$0xff]  }
 0x966   :  { %3056 = vmatpush3.bf16.msra.mxu0 %v3331_v8  ;;  %v3371_v8 = vld [vmem:[#allocation22 + $0x8c] ss:$16 sps:$4 sm:$0xff]  }
 0x967   :  { %3057 = vmatprep.subr.bf16.mxu0 %v3332_v9  ;;  %v3366_v9 = vld [vmem:[#allocation22 + $0x80] ss:$16 sps:$4 sm:$0xff]  }
 0x96a   :  { %3058 = vmatpush3.bf16.msra.mxu0 %v3333_v10  ;;  %v3369_v10 = vld [vmem:[#allocation22 + $0x88] ss:$16 sps:$4 sm:$0xff]  }
 0x96b   :  { %3059 = vmatprep.subr.bf16.mxu0 %v3334_v11  ;;  %v3374_v11 = vld [vmem:[#allocation22 + $0xa4] ss:$16 sps:$4 sm:$0xff]  }
 0x96e   :  { %3060 = vmatpush3.bf16.msra.mxu0 %v3335_v12  ;;  %v3377_v12 = vld [vmem:[#allocation22 + $0xac] ss:$16 sps:$4 sm:$0xff]  }
 0x96f   :  { %3061 = vmatprep.subr.bf16.mxu0 %v3336_v13  ;;  %v3372_v13 = vld [vmem:[#allocation22 + $0xa0] ss:$16 sps:$4 sm:$0xff]  }
 0x972   :  { %3062 = vmatpush3.bf16.msra.mxu0 %v3337_v14  ;;  %v3375_v14 = vld [vmem:[#allocation22 + $0xa8] ss:$16 sps:$4 sm:$0xff]  }
 0x973   :  { %3063 = vmatprep.subr.bf16.mxu0 %v3338_v25  ;;  %v3390_v25 = vld [vmem:[#allocation22 + $0x100] ss:$16 sps:$4 sm:$0xff]  }
 0x976   :  { %3064 = vmatpush3.bf16.msra.mxu0 %v3339_v26  ;;  %v3393_v26 = vld [vmem:[#allocation22 + $0x108] ss:$16 sps:$4 sm:$0xff]  }
 0x977   :  { %3065 = vmatprep.subr.bf16.mxu0 %v3340_v29  ;;  %v3398_v29 = vld [vmem:[#allocation22 + $0x124] ss:$16 sps:$4 sm:$0xff]  }
 0x97a   :  { %3066 = vmatpush3.bf16.msra.mxu0 %v3341_v27  ;;  %v3401_v27 = vld [vmem:[#allocation22 + $0x12c] ss:$16 sps:$4 sm:$0xff]  }
 0x97b   :  { %2573 = vmatprep.subr.bf16.mxu0 %v3347_v57  ;;  %v3431_v57 = vld [vmem:[#allocation22 + $0x1cc] ss:$16 sps:$4 sm:$0xff]  }
 0xa30   :  { %v3045_v34 = vpop.f32.mrb[20].mxu0 }
 0xa31   :  { %v3046_v36 = vpop.f32.mrb[21].mxu0 }
 0xa32   :  { %v3047_v37 = vadd.f32 %v3046_v36, %v3045_v34  ;;  %v3048_v38 = vpop.f32.mrb[22].mxu0 }
 0xa33   :  { %v3049_v39 = vpop.f32.mrb[23].mxu0 }
 0xa34   :  { %v1737_v40 = vadd.f32 %v3047_v37, %v2863_v35 }
 0xa36   :  { %v1742_v41 = vadd.f32 %v1737_v40, %v1413_v15 }
 0xa38   :  { %1745 = vadd.xlane.f32.xlu0 %v1742_v41 }
 0xac5   :  { %v1746_v48 = vpop.xlane.xlu0 %1745 }
 0xac6   :  { %v1747_v51 = vmul.f32 0.0078125, %v1746_v48 }
 0xac8   :  { %v1748_v53 = vsub.f32 %v1742_v41, %v1747_v51 }
 0xaca   :  { %v1749_v55 = vmul.f32 %v1748_v53, %v1748_v53 }
 0xacc   :  { %1750 = vadd.xlane.f32.xlu0 %v1749_v55  ;;  %v3344_v55 = vld [vmem:[#allocation22 + $0x4] ss:$16 sps:$4 sm:$0xff]  }
 0xacd   :  { %2532 = vmatprep.subr.bf16.mxu1 %v3344_v55  ;;  %v212_v55 = vld [vmem:[%s4295_s23] sm:$0xff] }
 0xb59   :  { %v1751_v15 = vpop.xlane.xlu0 %1750 }
 0xb5a   :  { %v1752_v16 = vmul.f32 0.0078125, %v1751_v15  ;;  %v3380_v15 = vld [vmem:[#allocation22 + $0xc4] ss:$16 sps:$4 sm:$0xff]  }
 0xb5c   :  { %v1753_v17 = vadd.f32 1e-05, %v1752_v16  ;;  %v3383_v16 = vld [vmem:[#allocation22 + $0xcc] ss:$16 sps:$4 sm:$0xff]  }
 0xb5e   :  { %3464 = vrsqrt.f32 %v1753_v17  ;;  %v3378_v17 = vld [vmem:[#allocation22 + $0xc0] ss:$16 sps:$4 sm:$0xff]  }
 0xb68   :  { %v3465_v18 = vpop.eup %3464 }
 0xb69   :  { %v1755_v20 = vmul.f32 %v3465_v18, %v1748_v53  ;;  %v3342_v53 = vld [vmem:[#allocation22] ss:$16 sps:$4 sm:$0xff]   ;;  %v3381_v18 = vld [vmem:[#allocation22 + $0xc8] ss:$16 sps:$4 sm:$0xff]  }
 0xb6b   :  { %v1760_v22 = vmul.f32 %v2880_v19, %v1755_v20  ;;  %v3386_v19 = vld [vmem:[#allocation22 + $0xe4] ss:$16 sps:$4 sm:$0xff]   ;;  %v3389_v20 = vld [vmem:[#allocation22 + $0xec] ss:$16 sps:$4 sm:$0xff]  }
 0xb6d   :  { %v1765_v23 = vadd.f32 %v2881_v21, %v1760_v22  ;;  %v3384_v21 = vld [vmem:[#allocation22 + $0xe0] ss:$16 sps:$4 sm:$0xff]   ;;  %v3387_v22 = vld [vmem:[#allocation22 + $0xe8] ss:$16 sps:$4 sm:$0xff]  }
 0xb6f   :  { %v1782_v24 = vpack.c.bf16 %v1765_v23, %v1765_v23 }
 0xb71   :  { %1909 = vmatmul.mubr.bf16.vlgmr.msra.gmra.mrb[20].mxu1 %v1782_v24  ;;  %v3395_v24 = vld [vmem:[#allocation22 + $0x10c] ss:$16 sps:$4 sm:$0xff]  }
 0xb72   :  { %2533 = vmatpush1.bf16.msra.mxu1 %v3342_v53  ;;  %v3423_v53 = vld [vmem:[#allocation22 + $0x1a8] ss:$16 sps:$4 sm:$0xff]  }
 0xb73   :  { %2534 = vmatprep.subr.bf16.mxu1 %v3350_v59  ;;  %v2188_v59 = vpack.c.bf16 %v212_v55, %v212_v55 }
 0xb75   :  { %2564 = vmatprep.mubr.bf16.mxu1 %v2188_v59 }
 0xb76   :  { %2535 = vmatpush1.bf16.msra.mxu1 %v3348_v58  ;;  %v3429_v58 = vld [vmem:[#allocation22 + $0x1c8] ss:$16 sps:$4 sm:$0xff]  }
 0xb77   :  { %2536 = vmatprep.subr.bf16.mxu1 %v3356_v62  ;;  %v3437_v62 = vld [vmem:[#allocation22 + $0x1ec] ss:$16 sps:$4 sm:$0xff]  }
 0xb7a   :  { %2537 = vmatpush1.bf16.msra.mxu1 %v3354_v1  ;;  %v3435_v1 = vld [vmem:[#allocation22 + $0x1e8] ss:$16 sps:$4 sm:$0xff]  }
 0xb7b   :  { %2538 = vmatprep.subr.bf16.mxu1 %v3362_v3 }
 0xb7e   :  { %2539 = vmatpush1.bf16.msra.mxu1 %v3360_v5 }
 0xb7f   :  { %2540 = vmatprep.subr.bf16.mxu1 %v3368_v7 }
 0xb82   :  { %2541 = vmatpush1.bf16.msra.mxu1 %v3366_v9 }
 0xb83   :  { %2542 = vmatprep.subr.bf16.mxu1 %v3374_v11 }
 0xb86   :  { %2543 = vmatpush1.bf16.msra.mxu1 %v3372_v13  ;;  %v3439_v13 = vld [vmem:[#allocation24 + $0x8] sm:$0xff]  }
 0xb87   :  { %2544 = vmatprep.subr.bf16.mxu1 %v3380_v15  ;;  %v3441_v15 = vld [vmem:[#allocation24 + $0x18] sm:$0xff]  }
 0xb8a   :  { %2545 = vmatpush1.bf16.msra.mxu1 %v3378_v17  ;;  %v3443_v17 = vld [vmem:[#allocation24 + $0x28] sm:$0xff]  }
 0xb8b   :  { %2546 = vmatprep.subr.bf16.mxu1 %v3386_v19  ;;  %v3445_v19 = vld [vmem:[#allocation24 + $0x38] sm:$0xff]  }
 0xb8e   :  { %2547 = vmatpush1.bf16.msra.mxu1 %v3384_v21 }
 0xc44   :  { %v1910_v32 = vpop.f32.mrb[20].mxu1 }
 0xc45   :  { %v1911_v33 = vadd.f32 %v1910_v32, %v1789_v30  ;;  %v1912_v34 = vpop.f32.mrb[21].mxu1  ;;  %v3399_v30 = vld [vmem:[#allocation22 + $0x128] ss:$16 sps:$4 sm:$0xff]   ;;  %v3407_v32 = vld [vmem:[#allocation22 + $0x14c] ss:$16 sps:$4 sm:$0xff]  }
 0xc46   :  { %v1913_v35 = vadd.f32 %v1912_v34, %v1793_v31  ;;  %v1914_v36 = vpop.f32.mrb[22].mxu1  ;;  %v3404_v31 = vld [vmem:[#allocation22 + $0x144] ss:$16 sps:$4 sm:$0xff]   ;;  %v3405_v34 = vld [vmem:[#allocation22 + $0x148] ss:$16 sps:$4 sm:$0xff]  }
 0xc47   :  { %v1917_v37 = vmax.f32 %v1911_v33, 0.0  ;;  %v1915_v38 = vpop.f32.mrb[23].mxu1  ;;  %v3402_v33 = vld [vmem:[#allocation22 + $0x140] ss:$16 sps:$4 sm:$0xff]  }
 0xc48   :  { %v1918_v39 = vmax.f32 %v1913_v35, 0.0 }
 0xc49   :  { %v1951_v41 = vpack.c.bf16 %v1917_v37, %v1917_v37 }
 0xc4a   :  { %v1952_v40 = vpack.c.bf16 %v1918_v39, %v1918_v39  ;;  %v3410_v39 = vld [vmem:[#allocation22 + $0x164] ss:$16 sps:$4 sm:$0xff]  }
 0xc4c   :  { %2086 = vmatprep.mubr.bf16.mxu0 %v1952_v40  ;;  %v3413_v40 = vld [vmem:[#allocation22 + $0x16c] ss:$16 sps:$4 sm:$0xff]  }
 0xc4d   :  { %2087 = vmatmul.mubr.bf16.vlgmr.msra.gmra.mrb[24].mxu0 %v1951_v41  ;;  %v3408_v41 = vld [vmem:[#allocation22 + $0x160] ss:$16 sps:$4 sm:$0xff]  }
 0xc4e   :  { %2574 = vmatpush1.bf16.msra.mxu0 %v3345_v56  ;;  %v3428_v56 = vld [vmem:[#allocation22 + $0x1c4] ss:$16 sps:$4 sm:$0xff]   ;;  %2605 = vmatprep.mubr.bf16.mxu0 %v2188_v59 }
 0xc4f   :  { %2575 = vmatprep.subr.bf16.mxu0 %v3353_v60  ;;  %v3426_v60 = vld [vmem:[#allocation22 + $0x1c0] ss:$16 sps:$4 sm:$0xff]  }
 0xc52   :  { %2576 = vmatpush1.bf16.msra.mxu0 %v3351_v61  ;;  %v3434_v61 = vld [vmem:[#allocation22 + $0x1e4] ss:$16 sps:$4 sm:$0xff]  }
 0xc53   :  { %2577 = vmatprep.subr.bf16.mxu0 %v3359_v63  ;;  %v3432_v63 = vld [vmem:[#allocation22 + $0x1e0] ss:$16 sps:$4 sm:$0xff]  }
 0xc56   :  { %2578 = vmatpush1.bf16.msra.mxu0 %v3357_v2 }
 0xc57   :  { %2579 = vmatprep.subr.bf16.mxu0 %v3365_v4 }
 0xc5a   :  { %2580 = vmatpush1.bf16.msra.mxu0 %v3363_v6  ;;  %v2916_v6 = vld [vmem:[#allocation12 + $0x11] ss:$0 sm:$0xff] }
 0xc5b   :  { %2581 = vmatprep.subr.bf16.mxu0 %v3371_v8  ;;  %v2917_v8 = vld [vmem:[#allocation12 + $0x12] ss:$0 sm:$0xff] }
 0xc5e   :  { %2582 = vmatpush1.bf16.msra.mxu0 %v3369_v10 }
 0xc5f   :  { %2583 = vmatprep.subr.bf16.mxu0 %v3377_v12  ;;  %v3438_v12 = vld [vmem:[#allocation24] sm:$0xff]  }
 0xc62   :  { %2584 = vmatpush1.bf16.msra.mxu0 %v3375_v14  ;;  %v3440_v14 = vld [vmem:[#allocation24 + $0x10] sm:$0xff]  }
 0xc63   :  { %2585 = vmatprep.subr.bf16.mxu0 %v3383_v16  ;;  %v3442_v16 = vld [vmem:[#allocation24 + $0x20] sm:$0xff]  }
 0xc66   :  { %2586 = vmatpush1.bf16.msra.mxu0 %v3381_v18  ;;  %v3444_v18 = vld [vmem:[#allocation24 + $0x30] sm:$0xff]  }
 0xc67   :  { %2587 = vmatprep.subr.bf16.mxu0 %v3389_v20  ;;  %v2918_v20 = vld [vmem:[%s4272_s7 + $0x3] ss:$8 sm:$0xf] }
 0xc68   :  { %v2195_v21 = vrot.slane %v2918_v20, %v4123_v54 }
 0xc6a   :  { %2588 = vmatpush1.bf16.msra.mxu0 %v3387_v22  ;;  %v2199_v22 = vrot.slane %v2918_v20, %v4118_v52 }
 0xc6b   :  { %2589 = vmatprep.subr.bf16.mxu0 %v3395_v24 }
 0xc6e   :  { %2590 = vmatpush1.bf16.msra.mxu0 %v3393_v26  ;;  %v2203_v26 = vrot.slane %v2918_v20, %v383_v50 }
 0xc6f   :  { %2591 = vmatprep.subr.bf16.mxu0 %v3401_v27  ;;  %v2206_v27 = vsub.s32 3, %v4111_v49 }
 0xc71   :  { %v2207_v52 = vrot.slane %v2918_v20, %v2206_v27 }
 0xc72   :  { %2592 = vmatpush1.bf16.msra.mxu0 %v3399_v30 }
 0xc73   :  { %2593 = vmatprep.subr.bf16.mxu0 %v3407_v32 }
 0xc76   :  { %2594 = vmatpush1.bf16.msra.mxu0 %v3405_v34 }
 0xc77   :  { %2595 = vmatprep.subr.bf16.mxu0 %v3413_v40 }
 0xd20   :  { %v3067_v42 = vpop.f32.mrb[24].mxu0 }
 0xd21   :  { %v3068_v44 = vpop.f32.mrb[25].mxu0 }
 0xd22   :  { %v3069_v46 = vadd.f32 %v3068_v44, %v3067_v42  ;;  %v3070_v45 = vpop.f32.mrb[26].mxu0  ;;  %v3411_v42 = vld [vmem:[#allocation22 + $0x168] ss:$16 sps:$4 sm:$0xff]   ;;  %v3414_v44 = vld [vmem:[#allocation22 + $0x180] ss:$16 sps:$4 sm:$0xff]  }
 0xd23   :  { %v3071_v47 = vpop.f32.mrb[27].mxu0  ;;  %2596 = vmatpush1.bf16.msra.mxu0 %v3411_v42  ;;  %v3419_v45 = vld [vmem:[#allocation22 + $0x18c] ss:$16 sps:$4 sm:$0xff]  }
 0xd24   :  { %v2089_v48 = vadd.f32 %v3069_v46, %v2899_v43  ;;  %v3416_v43 = vld [vmem:[#allocation22 + $0x184] ss:$16 sps:$4 sm:$0xff]   ;;  %v3417_v46 = vld [vmem:[#allocation22 + $0x188] ss:$16 sps:$4 sm:$0xff]   ;;  %2597 = vmatprep.subr.bf16.mxu0 %v3419_v45 }
 0xd25   :  { %v3422_v47 = vld [vmem:[#allocation22 + $0x1a4] ss:$16 sps:$4 sm:$0xff]  }
 0xd26   :  { %v4207_v51 = vadd.f32 %v2089_v48, %v1765_v23  ;;  %v3392_v23 = vld [vmem:[#allocation22 + $0x104] ss:$16 sps:$4 sm:$0xff]   ;;  %v3425_v48 = vld [vmem:[#allocation22 + $0x1ac] ss:$16 sps:$4 sm:$0xff]  }
 0xd27   :  { %2548 = vmatprep.subr.bf16.mxu1 %v3392_v23  ;;  %2598 = vmatpush1.bf16.msra.mxu0 %v3417_v46 }
 0xd28   :  { %2097 = vadd.xlane.f32.xlu1 %v4207_v51  ;;  %2549 = vmatpush1.bf16.msra.mxu1 %v3390_v25 }
 0xd29   :  { %2550 = vmatprep.subr.bf16.mxu1 %v3398_v29  ;;  %2599 = vmatprep.subr.bf16.mxu0 %v3425_v48 }
 0xd2b   :  { %2600 = vmatpush1.bf16.msra.mxu0 %v3423_v53 }
 0xd2c   :  { %2551 = vmatpush1.bf16.msra.mxu1 %v3396_v28  ;;  %2601 = vmatprep.subr.bf16.mxu0 %v3431_v57  ;;  %v2654_v57 = vld [vmem:[%s4272_s7 + $0x4] ss:$0 sm:$0xff] }
 0xd2d   :  { %2552 = vmatprep.subr.bf16.mxu1 %v3404_v31 }
 0xd2f   :  { %2602 = vmatpush1.bf16.msra.mxu0 %v3429_v58 }
 0xd30   :  { %2553 = vmatpush1.bf16.msra.mxu1 %v3402_v33  ;;  %2603 = vmatprep.subr.bf16.mxu0 %v3437_v62 }
 0xd31   :  { %2554 = vmatprep.subr.bf16.mxu1 %v3410_v39 }
 0xd33   :  { %2604 = vmatpush1.bf16.msra.mxu0 %v3435_v1 }
 0xd34   :  { %2555 = vmatpush1.bf16.msra.mxu1 %v3408_v41  ;;  %v214_v41 = vld [vmem:[%s4268_s3] sm:$0xff]  ;;  %s3808_s3 = smov [#allocation25]  }
 0xd35   :  { %2556 = vmatprep.subr.bf16.mxu1 %v3416_v43  ;;  %s2763_s26 = sshll.u32 %s3808_s3, 4  ;;  %s2764_s26 = int_to_ptr.vmem [resolvable:$true] %s2763_s26 }
 0xd36   :  { %s3724_s7 = scalar_lea.vmem %s2764_s26, 128  ;;  %p3729_p5 = scmp.lt.s32.totalorder %s2764_s26, %s2764_s26 }
 0xd37   :  { %p3725_p4 = scmp.ne.s32.totalorder %s2764_s26, %s3724_s7  ;;  %p3730_p6 = scmp.lt.s32.totalorder %s3724_s7, %s3724_s7 }
 0xd38   :  { %2557 = vmatpush1.bf16.msra.mxu1 %v3414_v44 }
 0xd39   :  { %2558 = vmatprep.subr.bf16.mxu1 %v3422_v47  ;;  %p3731_p7 = por %p3730_p6, %p3729_p5 }
 0xd3b   :  { %p3732_p8 = pnand %p3731_p7, %p3725_p4 }
 0xdb5   :  { %v2098_v35 = vpop.xlane.xlu1 %2097 }
 0xdb6   :  { %v2099_v36 = vmul.f32 0.0078125, %v2098_v35 }
 0xdb8   :  { %v2100_v37 = vsub.f32 %v4207_v51, %v2099_v36  ;;  %v3420_v51 = vld [vmem:[#allocation22 + $0x1a0] ss:$16 sps:$4 sm:$0xff]  }
 0xdb9   :  { %2559 = vmatpush1.bf16.msra.mxu1 %v3420_v51 }
 0xdba   :  { %v2101_v38 = vmul.f32 %v2100_v37, %v2100_v37  ;;  %2560 = vmatprep.subr.bf16.mxu1 %v3428_v56 }
 0xdbc   :  { %2102 = vadd.xlane.f32.xlu0 %v2101_v38 }
 0xdbd   :  { %2561 = vmatpush1.bf16.msra.mxu1 %v3426_v60 }
 0xdbe   :  { %2562 = vmatprep.subr.bf16.mxu1 %v3434_v61 }
 0xdc1   :  { %2563 = vmatpush1.bf16.msra.mxu1 %v3432_v63 }
 0xdc2   :  { %3174 = vmatprep.subr.bf16.mxu1 %v3803_v0 }
 0xe49   :  { %v2103_v2 = vpop.xlane.xlu0 %2102 }
 0xe4a   :  { %v2104_v3 = vmul.f32 0.0078125, %v2103_v2 }
 0xe4c   :  { %v2105_v4 = vadd.f32 1e-05, %v2104_v3 }
 0xe4e   :  { %3466 = vrsqrt.f32 %v2105_v4 }
 0xe58   :  { %v3467_v5 = vpop.eup %3466 }
 0xe59   :  { %v2107_v7 = vmul.f32 %v3467_v5, %v2100_v37 }
 0xe5b   :  { %v2112_v9 = vmul.f32 %v2916_v6, %v2107_v7 }
 0xe5d   :  { %v2117_v10 = vadd.f32 %v2917_v8, %v2112_v9 }
 0xe5f   :  { %v2187_v11 = vpack.c.bf16 %v2117_v10, %v2117_v10 }
 0xe61   :  { %2565 = vmatmul.mubr.bf16.vlgmr.msra.gmra.mrb[24].mxu1 %v2187_v11  ;;  %2606 = vmatmul.mubr.bf16.vlgmr.msra.gmra.mrb[28].mxu0 %v2187_v11 }
 0xe62   :  { %3190 = vmatprep.mubr.msk.bf16.mxu1 %vm3804_vm0, %v3803_v0  ;;  %3175 = vmatpush3.bf16.msra.mxu1 %v3438_v12 }
 0xe63   :  { %3176 = vmatprep.subr.bf16.mxu1 %v3803_v0 }
 0xe66   :  { %3177 = vmatpush3.bf16.msra.mxu1 %v3439_v13 }
 0xe67   :  { %3178 = vmatprep.subr.bf16.mxu1 %v3803_v0 }
 0xe6a   :  { %3179 = vmatpush3.bf16.msra.mxu1 %v3440_v14 }
 0xe6b   :  { %3180 = vmatprep.subr.bf16.mxu1 %v3803_v0 }
 0xe6e   :  { %3181 = vmatpush3.bf16.msra.mxu1 %v3441_v15 }
 0xe6f   :  { %3182 = vmatprep.subr.bf16.mxu1 %v3803_v0 }
 0xe72   :  { %3183 = vmatpush3.bf16.msra.mxu1 %v3442_v16 }
 0xe73   :  { %3184 = vmatprep.subr.bf16.mxu1 %v3803_v0 }
 0xe76   :  { %3185 = vmatpush3.bf16.msra.mxu1 %v3443_v17 }
 0xe77   :  { %3186 = vmatprep.subr.bf16.mxu1 %v3803_v0 }
 0xe7a   :  { %3187 = vmatpush3.bf16.msra.mxu1 %v3444_v18 }
 0xe7b   :  { %3188 = vmatprep.subr.bf16.mxu1 %v3803_v0 }
 0xe7e   :  { %3189 = vmatpush3.bf16.msra.mxu1 %v3445_v19 }
 0xf34   :  { %v2566_v23 = vpop.f32.mrb[24].mxu1  ;;  %v2607_v24 = vpop.f32.mrb[28].mxu0 }
 0xf35   :  { %v2567_v25 = vadd.f32 %v2566_v23, %v2195_v21  ;;  %v2568_v29 = vpop.f32.mrb[25].mxu1  ;;  %v2609_v0 = vpop.f32.mrb[29].mxu0  ;;  %v2608_v54 = vadd.f32 %v2607_v24, %v2203_v26 }
 0xf36   :  { %v2569_v28 = vadd.f32 %v2568_v29, %v2199_v22  ;;  %v2570_v30 = vpop.f32.mrb[26].mxu1  ;;  %v2611_v31 = vpop.f32.mrb[30].mxu0  ;;  %v2610_v36 = vadd.f32 %v2609_v0, %v2207_v52 }
 0xf37   :  { %v2614_v32 = vmul.f32 0.5, %v2567_v25  ;;  %v2571_v33 = vpop.f32.mrb[27].mxu1  ;;  %v2612_v34 = vpop.f32.mrb[31].mxu0 }
 0xf38   :  { %v2618_v35 = vmul.f32 0.5, %v2569_v28  ;;  %v2623_v37 = vmul.f32 0.5, %v2610_v36 }
 0xf39   :  { %3468 = vtanh.f32 %v2614_v32 }
 0xf3a   :  { %3470 = vtanh.f32 %v2618_v35 }
 0xf3b   :  { %3472 = vtanh.f32 %v2608_v54 }
 0xf3c   :  { %3474 = vtanh.f32 %v2623_v37 }
 0xf43   :  { %v3469_v38 = vpop.eup %3468 }
 0xf44   :  { %v3471_v50 = vpop.eup %3470  ;;  %v2616_v39 = vadd.f32 1.0, %v3469_v38 }
 0xf45   :  { %v2620_v40 = vadd.f32 1.0, %v3471_v50  ;;  %v3473_v42 = vpop.eup %3472 }
 0xf46   :  { %v2617_v49 = vmul.f32 0.5, %v2616_v39  ;;  %v3475_v47 = vpop.eup %3474 }
 0xf47   :  { %v2621_v43 = vmul.f32 0.5, %v2620_v40  ;;  %v2625_v48 = vadd.f32 1.0, %v3475_v47 }
 0xf48   :  { %v2629_v44 = vmul.f32 %v3473_v42, %v2617_v49 }
 0xf49   :  { %v2628_v46 = vmul.f32 %v2621_v43, %v214_v41  ;;  %v2626_v51 = vmul.f32 0.5, %v2625_v48 }
 0xf4b   :  { %v2630_v45 = vadd.f32 %v2629_v44, %v2628_v46 }
 0xf4d   :  { %3476 = vtanh.f32 %v2630_v45  ;;  %2636 = vst [vmem:[#allocation26] sm:$0xff] %v2630_v45 }
 0xf57   :  { %v3477_v53 = vpop.eup %3476 }
 0xf58   :  { %v2632_v55 = vmul.f32 %v3477_v53, %v2626_v51 }
 0xf5a   :  { %2635 = vst [vmem:[#allocation25] sm:$0xff] %v2632_v55  ;;  %v2653_v56 = vpack.c.bf16 %v2632_v55, %v2632_v55 }
 0xf5c   :  { %3191 = vmatmul.mubr.bf16.vlgmr.msra.gmra.mrb[28].mxu1 %v2653_v56 }
0x102f   :  { %v2737_v59 = vpop.f32.mrb[28].mxu1 }
0x1030   :  { %v2738_v60 = vadd.f32 %v2737_v59, %v2654_v57  ;;  %v3192_v58 = vpop.f32.mrb[29].mxu1 }
0x1031   :  { %v2740_v61 = vpop.f32.mrb[30].mxu1 }
0x1032   :  { %v3193_v62 = vpop.f32.mrb[31].mxu1  ;;  %vm2743_vm7 = vcmp.ne.f32.partialorder %v2738_v60, %v2738_v60 }
0x1033   :  { %v2744_v63 = vsel %vm2743_vm7, 0.0, %v2738_v60 }
0x1034   :  { %2745 = vmax.xlane.f32.xlu1 %v2744_v63 }
0x10c1   :  { %v2746_v1 = vpop.xlane.xlu1 %2745 }
0x10c2   :  { %v2747_v2 = vsub.f32 %v2744_v63, %v2746_v1 }
0x10c4   :  { %v2748_v3 = vmul.f32 1.442695, %v2747_v2 }
0x10c6   :  { %3478 = vpow2.f32 %v2748_v3 }
0x10d0   :  { %v3479_v4 = vpop.eup %3478 }
0x10d1   :  { %2750 = vadd.xlane.f32.xlu0 %v3479_v4 }
0x10d2   :  { %3735 = shalt.err (!%p3732_p8)
}
0x10d3   :  { %s3736_s19 = scalar_lea.hbm %s4282_s17, 128 }
0x10d4   :  { %p3737_p9 = scmp.ne.s32.totalorder %s4282_s17, %s3736_s19  ;;  %p3740_p10 = scmp.lt.u32.totalorder %s3736_s19, %s4282_s17 }
0x10d6   :  { %p3742_p11 = pnand %p3740_p10, %p3737_p9 }
0x10d8   :  { %3745 = shalt.err (!%p3742_p11)
}
0x10d9   :  { %2766 = dma.vmem_to_hbm [thread:$0]  %s2764_s26, 128, %s4282_s17, [#allocation9]  }
0x10da   :  { %s3746_s30 = scalar_lea.vmem %s2774_s12, 128  ;;  %p3751_p13 = scmp.lt.s32.totalorder %s2774_s12, %s2774_s12 }
0x10db   :  { %p3747_p12 = scmp.ne.s32.totalorder %s2774_s12, %s3746_s30  ;;  %p3752_p0 = scmp.lt.s32.totalorder %s3746_s30, %s3746_s30 }
0x10dd   :  { %p3753_p1 = por %p3752_p0, %p3751_p13 }
0x10df   :  { %p3754_p2 = pnand %p3753_p1, %p3747_p12 }
0x10e1   :  { %3757 = shalt.err (!%p3754_p2)
}
0x10e2   :  { %s3758_s22 = scalar_lea.hbm %s4283_s18, 128 }
0x10e3   :  { %p3759_p3 = scmp.ne.s32.totalorder %s4283_s18, %s3758_s22  ;;  %p3762_p4 = scmp.lt.u32.totalorder %s3758_s22, %s4283_s18 }
0x10e5   :  { %p3764_p5 = pnand %p3762_p4, %p3759_p3 }
0x10e7   :  { %3767 = shalt.err (!%p3764_p5)
}
0x10e8   :  { %2776 = dma.vmem_to_hbm [thread:$0]  %s2774_s12, 128, %s4283_s18, [#allocation27]  }
0x115e   :  { %v2751_v5 = vpop.xlane.xlu0 %2750 }
0x115f   :  { %3480 = vrcp.f32 %v2751_v5 }
0x1169   :  { %v3481_v6 = vpop.eup %3480 }
0x116a   :  { %v2753_v7 = vmul.f32 %v3481_v6, %v3479_v4 }
0x116c   :  { %2754 = vst [vmem:[%s4281_s16] sm:$0xff] %v2753_v7 }
0x116d   :  { %3780 = dma.done.wait [#allocation9], 128  }
0x116e   :  { %3781 = vsyncadd [#allocation9], 4294967168 }
0x116f   :  { %3782 = dma.done.wait [#allocation27], 128  }
0x1170   :  { %3783 = vsyncadd [#allocation27], 4294967168 }
0x1171   :  { %2785 = vsyncpa [#allocation8], 1 }
0x1172   :  { %2786 = vsyncpa [#allocation11], 1 }
0x1173   :  { %2787 = vsyncpa [#allocation14], 1 }
0x1174   :  { %2788 = vsyncpa [#allocation17], 1 }
0x1175   :  { %2789 = vsyncpa [#allocation20], 1 }
0x1176   :  { %2790 = vsyncpa [#allocation23], 1 }
0x1177   :  { %2791 = vsyncpa [#allocation9], 1 }
0x1178   :  { %2792 = vsyncpa [#allocation27], 1 }

</bundles_post_ra>
